<compile_context>
chip_gen: v7x
topology: tpu7x:2x2x1
jax: 0.10.0
libtpu: 0.0.40
codegen_flags: <defaults>
</compile_context>

<pallas_src>
import functools

import jax
import jax.numpy as jnp
from jax import lax
from jax.experimental import pallas as pl
from jax.experimental.pallas import tpu as pltpu

LANE = 128


def _round_up(x, m):
    return ((x + m - 1) // m) * m


def _dot_precision(weight_dtype):
    # f32 test path needs true-f32-ish matmuls to validate packing exactly;
    # bf16 path gets single-pass MXU (f32 accumulation via
    # preferred_element_type) with no extra passes.
    return lax.Precision.HIGHEST if weight_dtype == jnp.float32 else None


def gru_seq_kernel(x_ref, h0_ref, wih_ref, whh_ref, bi_ref, bhn_ref, out_ref,
                   *, precision):
    """Full GRU recurrence over the sequence in one kernel invocation.

    x_ref   : (T, Hp)   embedded tokens (weight_dtype), pre-gathered slab.
    h0_ref  : (1, Hp)   f32 initial hidden state.
    wih_ref : (Hp, 3Hp) packed input weights,  gates [r | z | n] on lanes.
    whh_ref : (Hp, 3Hp) packed hidden weights, gates [r | z | n] on lanes.
    bi_ref  : (1, 3Hp)  folded biases [b_ir+b_hr | b_iz+b_hz | b_in].
    bhn_ref : (1, Hp)   hidden-side n-gate bias b_hn.
    out_ref : (T, Hp)   f32 per-step GRU outputs (row t == hidden after t).
    """
    seq_len = x_ref.shape[0]
    Hp = h0_ref.shape[1]

    # Loaded once; VMEM-resident for the entire sequence.
    wih = wih_ref[...]
    whh = whh_ref[...]
    bi = bi_ref[...]
    bhn = bhn_ref[...]

    def step(t, h):
        x = x_ref[pl.ds(t, 1), :]                       # (1, Hp) weight_dtype
        # Two wide MXU matmuls per step (gates packed along lanes).
        gi = jnp.dot(x, wih, preferred_element_type=jnp.float32,
                     precision=precision) + bi
        gh = jnp.dot(h.astype(whh.dtype), whh,
                     preferred_element_type=jnp.float32, precision=precision)
        r = jax.nn.sigmoid(gi[:, :Hp] + gh[:, :Hp])
        z = jax.nn.sigmoid(gi[:, Hp:2 * Hp] + gh[:, Hp:2 * Hp])
        n = jnp.tanh(gi[:, 2 * Hp:] + r * (gh[:, 2 * Hp:] + bhn))
        h_new = (1.0 - z) * n + z * h                    # f32 gate math
        out_ref[pl.ds(t, 1), :] = h_new                  # resident VMEM block
        return h_new

    # Hidden carried as a loop value (vregs); fully unrolled so the scheduler
    # can overlap the next row load / output store with EUP/VPU gate math.
    lax.fori_loop(0, seq_len, step, h0_ref[...], unroll=True)


def pack_encoder_params(params, weight_dtype=jnp.bfloat16):
    """Pack PyTorch-layout params into lane-dense, gate-packed kernel layout."""
    emb = params["embedding"]                       # (V, H)
    w_ih, w_hh = params["w_ih"], params["w_hh"]     # (3H, H) each, rows [r;z;n]
    b_ih, b_hh = params["b_ih"], params["b_hh"]     # (3H,) each
    V, H = emb.shape
    Hp = _round_up(H, LANE)

    # Embedding table stored directly in the MXU input dtype (no per-step cast).
    emb_p = jnp.zeros((V, Hp), jnp.float32).at[:, :H].set(emb).astype(weight_dtype)

    def pack_w(w):
        # (3H, H) torch layout -> (Hp, 3Hp): x @ packed == [x@W_r^T|x@W_z^T|x@W_n^T]
        wp = jnp.zeros((Hp, 3 * Hp), jnp.float32)
        for g in range(3):
            wp = wp.at[:H, g * Hp:g * Hp + H].set(w[g * H:(g + 1) * H, :].T)
        return wp.astype(weight_dtype)

    b_i = jnp.zeros((1, 3 * Hp), jnp.float32)
    b_i = b_i.at[0, 0 * Hp:0 * Hp + H].set(b_ih[:H] + b_hh[:H])            # r
    b_i = b_i.at[0, 1 * Hp:1 * Hp + H].set(b_ih[H:2 * H] + b_hh[H:2 * H])  # z
    b_i = b_i.at[0, 2 * Hp:2 * Hp + H].set(b_ih[2 * H:])                   # n (input)

    b_hn = jnp.zeros((1, Hp), jnp.float32).at[0, :H].set(b_hh[2 * H:])     # n (hidden)

    return dict(emb=emb_p, wih=pack_w(w_ih), whh=pack_w(w_hh),
                b_i=b_i, b_hn=b_hn, H=H, Hp=Hp)


def encoder_rnn_forward(tokens, hidden0, params, weight_dtype=jnp.bfloat16):
    """Pallas equivalent of running EncoderRNN.forward over a token sequence.

    tokens  : (T,) int32 token ids
    hidden0 : (1, 1, H) f32 initial hidden state (initHidden())
    returns (outputs (T, 1, H), hidden (1, 1, H))   [T=1 reproduces the module]
    """
    packed = pack_encoder_params(params, weight_dtype)
    H, Hp = packed["H"], packed["Hp"]
    T = int(tokens.shape[0])

    # Pre-gather the embedding rows once in the wrapper -> resident (T, Hp) slab.
    x_slab = jnp.take(packed["emb"], tokens.astype(jnp.int32), axis=0)

    h0 = jnp.zeros((1, Hp), jnp.float32).at[:, :H].set(hidden0.reshape(1, H))

    kernel = functools.partial(gru_seq_kernel,
                               precision=_dot_precision(weight_dtype))

    vmem_spec = pl.BlockSpec(memory_space=pltpu.MemorySpace.VMEM)
    out_padded = pl.pallas_call(
        kernel,
        out_shape=jax.ShapeDtypeStruct((T, Hp), jnp.float32),
        in_specs=[vmem_spec] * 6,       # whole arrays, VMEM-resident, loaded once
        out_specs=vmem_spec,            # single writeback DMA at kernel end
    )(x_slab, h0, packed["wih"], packed["whh"], packed["b_i"], packed["b_hn"])

    outputs = out_padded[:, :H].reshape(T, 1, H)
    hidden = outputs[-1].reshape(1, 1, H)          # output == hidden for nn.GRU
    return outputs, hidden


def encoder_rnn_reference(tokens, hidden0, params, weight_dtype=jnp.bfloat16):
    """Pure-JAX reference (PyTorch nn.GRU semantics, gate order [r, z, n])."""
    emb = params["embedding"]
    w_ih = params["w_ih"].astype(weight_dtype)
    w_hh = params["w_hh"].astype(weight_dtype)
    b_ih, b_hh = params["b_ih"], params["b_hh"]
    H = emb.shape[1]
    precision = _dot_precision(weight_dtype)
    h = hidden0.reshape(1, H).astype(jnp.float32)
    outs = []
    for t in range(int(tokens.shape[0])):
        x = emb[tokens[t]].reshape(1, H)
        gi = jnp.dot(x.astype(weight_dtype), w_ih.T,
                     preferred_element_type=jnp.float32,
                     precision=precision) + b_ih
        gh = jnp.dot(h.astype(weight_dtype), w_hh.T,
                     preferred_element_type=jnp.float32,
                     precision=precision) + b_hh
        r = jax.nn.sigmoid(gi[:, :H] + gh[:, :H])
        z = jax.nn.sigmoid(gi[:, H:2 * H] + gh[:, H:2 * H])
        n = jnp.tanh(gi[:, 2 * H:] + r * gh[:, 2 * H:])
        h = (1.0 - z) * n + z * h
        outs.append(h)
    out = jnp.stack(outs, axis=0)
    return out, h.reshape(1, 1, H)


def init_params(key, input_size, hidden_size):
    """PyTorch-like init: nn.Embedding ~ N(0,1); GRU params ~ U(-1/sqrt(H), 1/sqrt(H))."""
    k_emb, k_wih, k_whh, k_bih, k_bhh = jax.random.split(key, 5)
    bound = hidden_size ** -0.5
    u = lambda k, shape: jax.random.uniform(
        k, shape, jnp.float32, minval=-bound, maxval=bound)
    return {
        "embedding": jax.random.normal(
            k_emb, (input_size, hidden_size), jnp.float32),
        "w_ih": u(k_wih, (3 * hidden_size, hidden_size)),   # weight_ih_l0
        "w_hh": u(k_whh, (3 * hidden_size, hidden_size)),   # weight_hh_l0
        "b_ih": u(k_bih, (3 * hidden_size,)),                # bias_ih_l0
        "b_hh": u(k_bhh, (3 * hidden_size,)),                # bias_hh_l0
    }


if __name__ == "__main__":
    VOCAB = 16
    HIDDEN = 32
    SEQ = 8

    params = init_params(jax.random.PRNGKey(0), VOCAB, HIDDEN)
    tokens = jax.random.randint(jax.random.PRNGKey(1), (SEQ,), 0, VOCAB,
                                dtype=jnp.int32)
    hidden0 = jnp.zeros((1, 1, HIDDEN), jnp.float32)   # EncoderRNN.initHidden()

    # Full-sequence run with bf16 weights (MXU-native), f32 accumulate/gates.
    out, h_new = encoder_rnn_forward(tokens, hidden0, params, jnp.bfloat16)
    out = jax.block_until_ready(out)
    h_new = jax.block_until_ready(h_new)
    out_ref, h_ref = encoder_rnn_reference(tokens, hidden0, params, jnp.bfloat16)
    assert out.shape == (SEQ, 1, HIDDEN) and h_new.shape == (1, 1, HIDDEN)
    assert jnp.allclose(out, out_ref, atol=2e-3, rtol=2e-3)
    assert jnp.allclose(h_new, h_ref, atol=2e-3, rtol=2e-3)

    # Single-step (T=1) run with f32 weights: matches the original module's
    # one-token forward() exactly (tight tolerance checks the packing math).
    out1, h1 = encoder_rnn_forward(tokens[:1], hidden0, params, jnp.float32)
    out1 = jax.block_until_ready(out1)
    out1_ref, h1_ref = encoder_rnn_reference(tokens[:1], hidden0, params,
                                             jnp.float32)
    assert out1.shape == (1, 1, HIDDEN) and h1.shape == (1, 1, HIDDEN)
    assert jnp.allclose(out1, out1_ref, atol=1e-4, rtol=1e-4)
    assert jnp.allclose(h1, h1_ref, atol=1e-4, rtol=1e-4)

    print("KERNEL_OK")
</pallas_src>

<mosaic_0001>
module attributes {stable_mosaic.version = 11 : i64} {
  func.func @gru_seq_kernel(%arg0: memref<8x128xbf16, #tpu.memory_space<vmem>>, %arg1: memref<1x128xf32, #tpu.memory_space<vmem>>, %arg2: memref<128x384xbf16, #tpu.memory_space<vmem>>, %arg3: memref<128x384xbf16, #tpu.memory_space<vmem>>, %arg4: memref<1x384xf32, #tpu.memory_space<vmem>>, %arg5: memref<1x128xf32, #tpu.memory_space<vmem>>, %arg6: memref<8x128xf32, #tpu.memory_space<vmem>>) attributes {dimension_semantics = [], scalar_prefetch = 0 : i64, scratch_operands = 0 : i64, tpu.core_type = #tpu.core_type<tc>} {
    %c0 = arith.constant 0 : index
    %c0_0 = arith.constant 0 : index
    %0 = vector.load %arg2[%c0, %c0_0] : memref<128x384xbf16, #tpu.memory_space<vmem>>, vector<128x384xbf16>
    %c0_1 = arith.constant 0 : index
    %c0_2 = arith.constant 0 : index
    %1 = vector.load %arg3[%c0_1, %c0_2] : memref<128x384xbf16, #tpu.memory_space<vmem>>, vector<128x384xbf16>
    %c0_3 = arith.constant 0 : index
    %c0_4 = arith.constant 0 : index
    %2 = vector.load %arg4[%c0_3, %c0_4] : memref<1x384xf32, #tpu.memory_space<vmem>>, vector<1x384xf32>
    %c0_5 = arith.constant 0 : index
    %c0_6 = arith.constant 0 : index
    %3 = vector.load %arg5[%c0_5, %c0_6] : memref<1x128xf32, #tpu.memory_space<vmem>>, vector<1x128xf32>
    %c0_7 = arith.constant 0 : index
    %c0_8 = arith.constant 0 : index
    %4 = vector.load %arg1[%c0_7, %c0_8] : memref<1x128xf32, #tpu.memory_space<vmem>>, vector<1x128xf32>
    %c0_i32 = arith.constant 0 : i32
    %5 = arith.index_cast %c0_i32 : i32 to index
    %c0_9 = arith.constant 0 : index
    %6 = vector.load %arg0[%5, %c0_9] : memref<8x128xbf16, #tpu.memory_space<vmem>>, vector<1x128xbf16>
    %cst = arith.constant dense<0.000000e+00> : vector<1x384xf32>
    %7 = tpu.matmul %6, %0, %cst {dimension_numbers = #tpu.dot_dimension_numbers<[1], [0], [0], [1], [0, 0, 1, 1], [], []>} : vector<1x128xbf16>, vector<128x384xbf16>, vector<1x384xf32> -> vector<1x384xf32>
    %8 = arith.addf %7, %2 : vector<1x384xf32>
    %9 = arith.truncf %4 : vector<1x128xf32> to vector<1x128xbf16>
    %cst_10 = arith.constant dense<0.000000e+00> : vector<1x384xf32>
    %10 = tpu.matmul %9, %1, %cst_10 {dimension_numbers = #tpu.dot_dimension_numbers<[1], [0], [0], [1], [0, 0, 1, 1], [], []>} : vector<1x128xbf16>, vector<128x384xbf16>, vector<1x384xf32> -> vector<1x384xf32>
    %11 = vector.extract_strided_slice %8 {offsets = [0, 0], sizes = [1, 128], strides = [1, 1]} : vector<1x384xf32> to vector<1x128xf32>
    %12 = vector.extract_strided_slice %10 {offsets = [0, 0], sizes = [1, 128], strides = [1, 1]} : vector<1x384xf32> to vector<1x128xf32>
    %13 = arith.addf %11, %12 : vector<1x128xf32>
    %14 = arith.negf %13 : vector<1x128xf32>
    %15 = math.exp %14 : vector<1x128xf32>
    %cst_11 = arith.constant 1.000000e+00 : f32
    %16 = vector.broadcast %cst_11 : f32 to vector<1x128xf32>
    %17 = arith.addf %16, %15 : vector<1x128xf32>
    %18 = arith.divf %16, %17 : vector<1x128xf32>
    %19 = vector.extract_strided_slice %8 {offsets = [0, 128], sizes = [1, 128], strides = [1, 1]} : vector<1x384xf32> to vector<1x128xf32>
    %20 = vector.extract_strided_slice %10 {offsets = [0, 128], sizes = [1, 128], strides = [1, 1]} : vector<1x384xf32> to vector<1x128xf32>
    %21 = arith.addf %19, %20 : vector<1x128xf32>
    %22 = arith.negf %21 : vector<1x128xf32>
    %23 = math.exp %22 : vector<1x128xf32>
    %cst_12 = arith.constant 1.000000e+00 : f32
    %24 = vector.broadcast %cst_12 : f32 to vector<1x128xf32>
    %25 = arith.addf %24, %23 : vector<1x128xf32>
    %26 = arith.divf %24, %25 : vector<1x128xf32>
    %27 = vector.extract_strided_slice %8 {offsets = [0, 256], sizes = [1, 128], strides = [1, 1]} : vector<1x384xf32> to vector<1x128xf32>
    %28 = vector.extract_strided_slice %10 {offsets = [0, 256], sizes = [1, 128], strides = [1, 1]} : vector<1x384xf32> to vector<1x128xf32>
    %29 = arith.addf %28, %3 : vector<1x128xf32>
    %30 = arith.mulf %18, %29 : vector<1x128xf32>
    %31 = arith.addf %27, %30 : vector<1x128xf32>
    %32 = math.tanh %31 : vector<1x128xf32>
    %cst_13 = arith.constant 1.000000e+00 : f32
    %33 = vector.broadcast %cst_13 : f32 to vector<1x128xf32>
    %34 = arith.subf %33, %26 : vector<1x128xf32>
    %35 = arith.mulf %34, %32 : vector<1x128xf32>
    %36 = arith.mulf %26, %4 : vector<1x128xf32>
    %37 = arith.addf %35, %36 : vector<1x128xf32>
    %38 = arith.index_cast %c0_i32 : i32 to index
    %c0_14 = arith.constant 0 : index
    %39 = vector.load %arg6[%38, %c0_14] : memref<8x128xf32, #tpu.memory_space<vmem>>, vector<1x128xf32>
    tpu.vector_store %arg6[%38, %c0_14], %37 {strides = array<i32>} : memref<8x128xf32, #tpu.memory_space<vmem>>, vector<1x128xf32>,
    %c1_i32 = arith.constant 1 : i32
    %40 = arith.index_cast %c1_i32 : i32 to index
    %c0_15 = arith.constant 0 : index
    %41 = vector.load %arg0[%40, %c0_15] : memref<8x128xbf16, #tpu.memory_space<vmem>>, vector<1x128xbf16>
    %cst_16 = arith.constant dense<0.000000e+00> : vector<1x384xf32>
    %42 = tpu.matmul %41, %0, %cst_16 {dimension_numbers = #tpu.dot_dimension_numbers<[1], [0], [0], [1], [0, 0, 1, 1], [], []>} : vector<1x128xbf16>, vector<128x384xbf16>, vector<1x384xf32> -> vector<1x384xf32>
    %43 = arith.addf %42, %2 : vector<1x384xf32>
    %44 = arith.truncf %37 : vector<1x128xf32> to vector<1x128xbf16>
    %cst_17 = arith.constant dense<0.000000e+00> : vector<1x384xf32>
    %45 = tpu.matmul %44, %1, %cst_17 {dimension_numbers = #tpu.dot_dimension_numbers<[1], [0], [0], [1], [0, 0, 1, 1], [], []>} : vector<1x128xbf16>, vector<128x384xbf16>, vector<1x384xf32> -> vector<1x384xf32>
    %46 = vector.extract_strided_slice %43 {offsets = [0, 0], sizes = [1, 128], strides = [1, 1]} : vector<1x384xf32> to vector<1x128xf32>
    %47 = vector.extract_strided_slice %45 {offsets = [0, 0], sizes = [1, 128], strides = [1, 1]} : vector<1x384xf32> to vector<1x128xf32>
    %48 = arith.addf %46, %47 : vector<1x128xf32>
    %49 = arith.negf %48 : vector<1x128xf32>
    %50 = math.exp %49 : vector<1x128xf32>
    %cst_18 = arith.constant 1.000000e+00 : f32
    %51 = vector.broadcast %cst_18 : f32 to vector<1x128xf32>
    %52 = arith.addf %51, %50 : vector<1x128xf32>
    %53 = arith.divf %51, %52 : vector<1x128xf32>
    %54 = vector.extract_strided_slice %43 {offsets = [0, 128], sizes = [1, 128], strides = [1, 1]} : vector<1x384xf32> to vector<1x128xf32>
    %55 = vector.extract_strided_slice %45 {offsets = [0, 128], sizes = [1, 128], strides = [1, 1]} : vector<1x384xf32> to vector<1x128xf32>
    %56 = arith.addf %54, %55 : vector<1x128xf32>
    %57 = arith.negf %56 : vector<1x128xf32>
    %58 = math.exp %57 : vector<1x128xf32>
    %cst_19 = arith.constant 1.000000e+00 : f32
    %59 = vector.broadcast %cst_19 : f32 to vector<1x128xf32>
    %60 = arith.addf %59, %58 : vector<1x128xf32>
    %61 = arith.divf %59, %60 : vector<1x128xf32>
    %62 = vector.extract_strided_slice %43 {offsets = [0, 256], sizes = [1, 128], strides = [1, 1]} : vector<1x384xf32> to vector<1x128xf32>
    %63 = vector.extract_strided_slice %45 {offsets = [0, 256], sizes = [1, 128], strides = [1, 1]} : vector<1x384xf32> to vector<1x128xf32>
    %64 = arith.addf %63, %3 : vector<1x128xf32>
    %65 = arith.mulf %53, %64 : vector<1x128xf32>
    %66 = arith.addf %62, %65 : vector<1x128xf32>
    %67 = math.tanh %66 : vector<1x128xf32>
    %cst_20 = arith.constant 1.000000e+00 : f32
    %68 = vector.broadcast %cst_20 : f32 to vector<1x128xf32>
    %69 = arith.subf %68, %61 : vector<1x128xf32>
    %70 = arith.mulf %69, %67 : vector<1x128xf32>
    %71 = arith.mulf %61, %37 : vector<1x128xf32>
    %72 = arith.addf %70, %71 : vector<1x128xf32>
    %73 = arith.index_cast %c1_i32 : i32 to index
    %c0_21 = arith.constant 0 : index
    %74 = vector.load %arg6[%73, %c0_21] : memref<8x128xf32, #tpu.memory_space<vmem>>, vector<1x128xf32>
    tpu.vector_store %arg6[%73, %c0_21], %72 {strides = array<i32>} : memref<8x128xf32, #tpu.memory_space<vmem>>, vector<1x128xf32>,
    %c2_i32 = arith.constant 2 : i32
    %75 = arith.index_cast %c2_i32 : i32 to index
    %c0_22 = arith.constant 0 : index
    %76 = vector.load %arg0[%75, %c0_22] : memref<8x128xbf16, #tpu.memory_space<vmem>>, vector<1x128xbf16>
    %cst_23 = arith.constant dense<0.000000e+00> : vector<1x384xf32>
    %77 = tpu.matmul %76, %0, %cst_23 {dimension_numbers = #tpu.dot_dimension_numbers<[1], [0], [0], [1], [0, 0, 1, 1], [], []>} : vector<1x128xbf16>, vector<128x384xbf16>, vector<1x384xf32> -> vector<1x384xf32>
    %78 = arith.addf %77, %2 : vector<1x384xf32>
    %79 = arith.truncf %72 : vector<1x128xf32> to vector<1x128xbf16>
    %cst_24 = arith.constant dense<0.000000e+00> : vector<1x384xf32>
    %80 = tpu.matmul %79, %1, %cst_24 {dimension_numbers = #tpu.dot_dimension_numbers<[1], [0], [0], [1], [0, 0, 1, 1], [], []>} : vector<1x128xbf16>, vector<128x384xbf16>, vector<1x384xf32> -> vector<1x384xf32>
    %81 = vector.extract_strided_slice %78 {offsets = [0, 0], sizes = [1, 128], strides = [1, 1]} : vector<1x384xf32> to vector<1x128xf32>
    %82 = vector.extract_strided_slice %80 {offsets = [0, 0], sizes = [1, 128], strides = [1, 1]} : vector<1x384xf32> to vector<1x128xf32>
    %83 = arith.addf %81, %82 : vector<1x128xf32>
    %84 = arith.negf %83 : vector<1x128xf32>
    %85 = math.exp %84 : vector<1x128xf32>
    %cst_25 = arith.constant 1.000000e+00 : f32
    %86 = vector.broadcast %cst_25 : f32 to vector<1x128xf32>
    %87 = arith.addf %86, %85 : vector<1x128xf32>
    %88 = arith.divf %86, %87 : vector<1x128xf32>
    %89 = vector.extract_strided_slice %78 {offsets = [0, 128], sizes = [1, 128], strides = [1, 1]} : vector<1x384xf32> to vector<1x128xf32>
    %90 = vector.extract_strided_slice %80 {offsets = [0, 128], sizes = [1, 128], strides = [1, 1]} : vector<1x384xf32> to vector<1x128xf32>
    %91 = arith.addf %89, %90 : vector<1x128xf32>
    %92 = arith.negf %91 : vector<1x128xf32>
    %93 = math.exp %92 : vector<1x128xf32>
    %cst_26 = arith.constant 1.000000e+00 : f32
    %94 = vector.broadcast %cst_26 : f32 to vector<1x128xf32>
    %95 = arith.addf %94, %93 : vector<1x128xf32>
    %96 = arith.divf %94, %95 : vector<1x128xf32>
    %97 = vector.extract_strided_slice %78 {offsets = [0, 256], sizes = [1, 128], strides = [1, 1]} : vector<1x384xf32> to vector<1x128xf32>
    %98 = vector.extract_strided_slice %80 {offsets = [0, 256], sizes = [1, 128], strides = [1, 1]} : vector<1x384xf32> to vector<1x128xf32>
    %99 = arith.addf %98, %3 : vector<1x128xf32>
    %100 = arith.mulf %88, %99 : vector<1x128xf32>
    %101 = arith.addf %97, %100 : vector<1x128xf32>
    %102 = math.tanh %101 : vector<1x128xf32>
    %cst_27 = arith.constant 1.000000e+00 : f32
    %103 = vector.broadcast %cst_27 : f32 to vector<1x128xf32>
    %104 = arith.subf %103, %96 : vector<1x128xf32>
    %105 = arith.mulf %104, %102 : vector<1x128xf32>
    %106 = arith.mulf %96, %72 : vector<1x128xf32>
    %107 = arith.addf %105, %106 : vector<1x128xf32>
    %108 = arith.index_cast %c2_i32 : i32 to index
    %c0_28 = arith.constant 0 : index
    %109 = vector.load %arg6[%108, %c0_28] : memref<8x128xf32, #tpu.memory_space<vmem>>, vector<1x128xf32>
    tpu.vector_store %arg6[%108, %c0_28], %107 {strides = array<i32>} : memref<8x128xf32, #tpu.memory_space<vmem>>, vector<1x128xf32>,
    %c3_i32 = arith.constant 3 : i32
    %110 = arith.index_cast %c3_i32 : i32 to index
    %c0_29 = arith.constant 0 : index
    %111 = vector.load %arg0[%110, %c0_29] : memref<8x128xbf16, #tpu.memory_space<vmem>>, vector<1x128xbf16>
    %cst_30 = arith.constant dense<0.000000e+00> : vector<1x384xf32>
    %112 = tpu.matmul %111, %0, %cst_30 {dimension_numbers = #tpu.dot_dimension_numbers<[1], [0], [0], [1], [0, 0, 1, 1], [], []>} : vector<1x128xbf16>, vector<128x384xbf16>, vector<1x384xf32> -> vector<1x384xf32>
    %113 = arith.addf %112, %2 : vector<1x384xf32>
    %114 = arith.truncf %107 : vector<1x128xf32> to vector<1x128xbf16>
    %cst_31 = arith.constant dense<0.000000e+00> : vector<1x384xf32>
    %115 = tpu.matmul %114, %1, %cst_31 {dimension_numbers = #tpu.dot_dimension_numbers<[1], [0], [0], [1], [0, 0, 1, 1], [], []>} : vector<1x128xbf16>, vector<128x384xbf16>, vector<1x384xf32> -> vector<1x384xf32>
    %116 = vector.extract_strided_slice %113 {offsets = [0, 0], sizes = [1, 128], strides = [1, 1]} : vector<1x384xf32> to vector<1x128xf32>
    %117 = vector.extract_strided_slice %115 {offsets = [0, 0], sizes = [1, 128], strides = [1, 1]} : vector<1x384xf32> to vector<1x128xf32>
    %118 = arith.addf %116, %117 : vector<1x128xf32>
    %119 = arith.negf %118 : vector<1x128xf32>
    %120 = math.exp %119 : vector<1x128xf32>
    %cst_32 = arith.constant 1.000000e+00 : f32
    %121 = vector.broadcast %cst_32 : f32 to vector<1x128xf32>
    %122 = arith.addf %121, %120 : vector<1x128xf32>
    %123 = arith.divf %121, %122 : vector<1x128xf32>
    %124 = vector.extract_strided_slice %113 {offsets = [0, 128], sizes = [1, 128], strides = [1, 1]} : vector<1x384xf32> to vector<1x128xf32>
    %125 = vector.extract_strided_slice %115 {offsets = [0, 128], sizes = [1, 128], strides = [1, 1]} : vector<1x384xf32> to vector<1x128xf32>
    %126 = arith.addf %124, %125 : vector<1x128xf32>
    %127 = arith.negf %126 : vector<1x128xf32>
    %128 = math.exp %127 : vector<1x128xf32>
    %cst_33 = arith.constant 1.000000e+00 : f32
    %129 = vector.broadcast %cst_33 : f32 to vector<1x128xf32>
    %130 = arith.addf %129, %128 : vector<1x128xf32>
    %131 = arith.divf %129, %130 : vector<1x128xf32>
    %132 = vector.extract_strided_slice %113 {offsets = [0, 256], sizes = [1, 128], strides = [1, 1]} : vector<1x384xf32> to vector<1x128xf32>
    %133 = vector.extract_strided_slice %115 {offsets = [0, 256], sizes = [1, 128], strides = [1, 1]} : vector<1x384xf32> to vector<1x128xf32>
    %134 = arith.addf %133, %3 : vector<1x128xf32>
    %135 = arith.mulf %123, %134 : vector<1x128xf32>
    %136 = arith.addf %132, %135 : vector<1x128xf32>
    %137 = math.tanh %136 : vector<1x128xf32>
    %cst_34 = arith.constant 1.000000e+00 : f32
    %138 = vector.broadcast %cst_34 : f32 to vector<1x128xf32>
    %139 = arith.subf %138, %131 : vector<1x128xf32>
    %140 = arith.mulf %139, %137 : vector<1x128xf32>
    %141 = arith.mulf %131, %107 : vector<1x128xf32>
    %142 = arith.addf %140, %141 : vector<1x128xf32>
    %143 = arith.index_cast %c3_i32 : i32 to index
    %c0_35 = arith.constant 0 : index
    %144 = vector.load %arg6[%143, %c0_35] : memref<8x128xf32, #tpu.memory_space<vmem>>, vector<1x128xf32>
    tpu.vector_store %arg6[%143, %c0_35], %142 {strides = array<i32>} : memref<8x128xf32, #tpu.memory_space<vmem>>, vector<1x128xf32>,
    %c4_i32 = arith.constant 4 : i32
    %145 = arith.index_cast %c4_i32 : i32 to index
    %c0_36 = arith.constant 0 : index
    %146 = vector.load %arg0[%145, %c0_36] : memref<8x128xbf16, #tpu.memory_space<vmem>>, vector<1x128xbf16>
    %cst_37 = arith.constant dense<0.000000e+00> : vector<1x384xf32>
    %147 = tpu.matmul %146, %0, %cst_37 {dimension_numbers = #tpu.dot_dimension_numbers<[1], [0], [0], [1], [0, 0, 1, 1], [], []>} : vector<1x128xbf16>, vector<128x384xbf16>, vector<1x384xf32> -> vector<1x384xf32>
    %148 = arith.addf %147, %2 : vector<1x384xf32>
    %149 = arith.truncf %142 : vector<1x128xf32> to vector<1x128xbf16>
    %cst_38 = arith.constant dense<0.000000e+00> : vector<1x384xf32>
    %150 = tpu.matmul %149, %1, %cst_38 {dimension_numbers = #tpu.dot_dimension_numbers<[1], [0], [0], [1], [0, 0, 1, 1], [], []>} : vector<1x128xbf16>, vector<128x384xbf16>, vector<1x384xf32> -> vector<1x384xf32>
    %151 = vector.extract_strided_slice %148 {offsets = [0, 0], sizes = [1, 128], strides = [1, 1]} : vector<1x384xf32> to vector<1x128xf32>
    %152 = vector.extract_strided_slice %150 {offsets = [0, 0], sizes = [1, 128], strides = [1, 1]} : vector<1x384xf32> to vector<1x128xf32>
    %153 = arith.addf %151, %152 : vector<1x128xf32>
    %154 = arith.negf %153 : vector<1x128xf32>
    %155 = math.exp %154 : vector<1x128xf32>
    %cst_39 = arith.constant 1.000000e+00 : f32
    %156 = vector.broadcast %cst_39 : f32 to vector<1x128xf32>
    %157 = arith.addf %156, %155 : vector<1x128xf32>
    %158 = arith.divf %156, %157 : vector<1x128xf32>
    %159 = vector.extract_strided_slice %148 {offsets = [0, 128], sizes = [1, 128], strides = [1, 1]} : vector<1x384xf32> to vector<1x128xf32>
    %160 = vector.extract_strided_slice %150 {offsets = [0, 128], sizes = [1, 128], strides = [1, 1]} : vector<1x384xf32> to vector<1x128xf32>
    %161 = arith.addf %159, %160 : vector<1x128xf32>
    %162 = arith.negf %161 : vector<1x128xf32>
    %163 = math.exp %162 : vector<1x128xf32>
    %cst_40 = arith.constant 1.000000e+00 : f32
    %164 = vector.broadcast %cst_40 : f32 to vector<1x128xf32>
    %165 = arith.addf %164, %163 : vector<1x128xf32>
    %166 = arith.divf %164, %165 : vector<1x128xf32>
    %167 = vector.extract_strided_slice %148 {offsets = [0, 256], sizes = [1, 128], strides = [1, 1]} : vector<1x384xf32> to vector<1x128xf32>
    %168 = vector.extract_strided_slice %150 {offsets = [0, 256], sizes = [1, 128], strides = [1, 1]} : vector<1x384xf32> to vector<1x128xf32>
    %169 = arith.addf %168, %3 : vector<1x128xf32>
    %170 = arith.mulf %158, %169 : vector<1x128xf32>
    %171 = arith.addf %167, %170 : vector<1x128xf32>
    %172 = math.tanh %171 : vector<1x128xf32>
    %cst_41 = arith.constant 1.000000e+00 : f32
    %173 = vector.broadcast %cst_41 : f32 to vector<1x128xf32>
    %174 = arith.subf %173, %166 : vector<1x128xf32>
    %175 = arith.mulf %174, %172 : vector<1x128xf32>
    %176 = arith.mulf %166, %142 : vector<1x128xf32>
    %177 = arith.addf %175, %176 : vector<1x128xf32>
    %178 = arith.index_cast %c4_i32 : i32 to index
    %c0_42 = arith.constant 0 : index
    %179 = vector.load %arg6[%178, %c0_42] : memref<8x128xf32, #tpu.memory_space<vmem>>, vector<1x128xf32>
    tpu.vector_store %arg6[%178, %c0_42], %177 {strides = array<i32>} : memref<8x128xf32, #tpu.memory_space<vmem>>, vector<1x128xf32>,
    %c5_i32 = arith.constant 5 : i32
    %180 = arith.index_cast %c5_i32 : i32 to index
    %c0_43 = arith.constant 0 : index
    %181 = vector.load %arg0[%180, %c0_43] : memref<8x128xbf16, #tpu.memory_space<vmem>>, vector<1x128xbf16>
    %cst_44 = arith.constant dense<0.000000e+00> : vector<1x384xf32>
    %182 = tpu.matmul %181, %0, %cst_44 {dimension_numbers = #tpu.dot_dimension_numbers<[1], [0], [0], [1], [0, 0, 1, 1], [], []>} : vector<1x128xbf16>, vector<128x384xbf16>, vector<1x384xf32> -> vector<1x384xf32>
    %183 = arith.addf %182, %2 : vector<1x384xf32>
    %184 = arith.truncf %177 : vector<1x128xf32> to vector<1x128xbf16>
    %cst_45 = arith.constant dense<0.000000e+00> : vector<1x384xf32>
    %185 = tpu.matmul %184, %1, %cst_45 {dimension_numbers = #tpu.dot_dimension_numbers<[1], [0], [0], [1], [0, 0, 1, 1], [], []>} : vector<1x128xbf16>, vector<128x384xbf16>, vector<1x384xf32> -> vector<1x384xf32>
    %186 = vector.extract_strided_slice %183 {offsets = [0, 0], sizes = [1, 128], strides = [1, 1]} : vector<1x384xf32> to vector<1x128xf32>
    %187 = vector.extract_strided_slice %185 {offsets = [0, 0], sizes = [1, 128], strides = [1, 1]} : vector<1x384xf32> to vector<1x128xf32>
    %188 = arith.addf %186, %187 : vector<1x128xf32>
    %189 = arith.negf %188 : vector<1x128xf32>
    %190 = math.exp %189 : vector<1x128xf32>
    %cst_46 = arith.constant 1.000000e+00 : f32
    %191 = vector.broadcast %cst_46 : f32 to vector<1x128xf32>
    %192 = arith.addf %191, %190 : vector<1x128xf32>
    %193 = arith.divf %191, %192 : vector<1x128xf32>
    %194 = vector.extract_strided_slice %183 {offsets = [0, 128], sizes = [1, 128], strides = [1, 1]} : vector<1x384xf32> to vector<1x128xf32>
    %195 = vector.extract_strided_slice %185 {offsets = [0, 128], sizes = [1, 128], strides = [1, 1]} : vector<1x384xf32> to vector<1x128xf32>
    %196 = arith.addf %194, %195 : vector<1x128xf32>
    %197 = arith.negf %196 : vector<1x128xf32>
    %198 = math.exp %197 : vector<1x128xf32>
    %cst_47 = arith.constant 1.000000e+00 : f32
    %199 = vector.broadcast %cst_47 : f32 to vector<1x128xf32>
    %200 = arith.addf %199, %198 : vector<1x128xf32>
    %201 = arith.divf %199, %200 : vector<1x128xf32>
    %202 = vector.extract_strided_slice %183 {offsets = [0, 256], sizes = [1, 128], strides = [1, 1]} : vector<1x384xf32> to vector<1x128xf32>
    %203 = vector.extract_strided_slice %185 {offsets = [0, 256], sizes = [1, 128], strides = [1, 1]} : vector<1x384xf32> to vector<1x128xf32>
    %204 = arith.addf %203, %3 : vector<1x128xf32>
    %205 = arith.mulf %193, %204 : vector<1x128xf32>
    %206 = arith.addf %202, %205 : vector<1x128xf32>
    %207 = math.tanh %206 : vector<1x128xf32>
    %cst_48 = arith.constant 1.000000e+00 : f32
    %208 = vector.broadcast %cst_48 : f32 to vector<1x128xf32>
    %209 = arith.subf %208, %201 : vector<1x128xf32>
    %210 = arith.mulf %209, %207 : vector<1x128xf32>
    %211 = arith.mulf %201, %177 : vector<1x128xf32>
    %212 = arith.addf %210, %211 : vector<1x128xf32>
    %213 = arith.index_cast %c5_i32 : i32 to index
    %c0_49 = arith.constant 0 : index
    %214 = vector.load %arg6[%213, %c0_49] : memref<8x128xf32, #tpu.memory_space<vmem>>, vector<1x128xf32>
    tpu.vector_store %arg6[%213, %c0_49], %212 {strides = array<i32>} : memref<8x128xf32, #tpu.memory_space<vmem>>, vector<1x128xf32>,
    %c6_i32 = arith.constant 6 : i32
    %215 = arith.index_cast %c6_i32 : i32 to index
    %c0_50 = arith.constant 0 : index
    %216 = vector.load %arg0[%215, %c0_50] : memref<8x128xbf16, #tpu.memory_space<vmem>>, vector<1x128xbf16>
    %cst_51 = arith.constant dense<0.000000e+00> : vector<1x384xf32>
    %217 = tpu.matmul %216, %0, %cst_51 {dimension_numbers = #tpu.dot_dimension_numbers<[1], [0], [0], [1], [0, 0, 1, 1], [], []>} : vector<1x128xbf16>, vector<128x384xbf16>, vector<1x384xf32> -> vector<1x384xf32>
    %218 = arith.addf %217, %2 : vector<1x384xf32>
    %219 = arith.truncf %212 : vector<1x128xf32> to vector<1x128xbf16>
    %cst_52 = arith.constant dense<0.000000e+00> : vector<1x384xf32>
    %220 = tpu.matmul %219, %1, %cst_52 {dimension_numbers = #tpu.dot_dimension_numbers<[1], [0], [0], [1], [0, 0, 1, 1], [], []>} : vector<1x128xbf16>, vector<128x384xbf16>, vector<1x384xf32> -> vector<1x384xf32>
    %221 = vector.extract_strided_slice %218 {offsets = [0, 0], sizes = [1, 128], strides = [1, 1]} : vector<1x384xf32> to vector<1x128xf32>
    %222 = vector.extract_strided_slice %220 {offsets = [0, 0], sizes = [1, 128], strides = [1, 1]} : vector<1x384xf32> to vector<1x128xf32>
    %223 = arith.addf %221, %222 : vector<1x128xf32>
    %224 = arith.negf %223 : vector<1x128xf32>
    %225 = math.exp %224 : vector<1x128xf32>
    %cst_53 = arith.constant 1.000000e+00 : f32
    %226 = vector.broadcast %cst_53 : f32 to vector<1x128xf32>
    %227 = arith.addf %226, %225 : vector<1x128xf32>
    %228 = arith.divf %226, %227 : vector<1x128xf32>
    %229 = vector.extract_strided_slice %218 {offsets = [0, 128], sizes = [1, 128], strides = [1, 1]} : vector<1x384xf32> to vector<1x128xf32>
    %230 = vector.extract_strided_slice %220 {offsets = [0, 128], sizes = [1, 128], strides = [1, 1]} : vector<1x384xf32> to vector<1x128xf32>
    %231 = arith.addf %229, %230 : vector<1x128xf32>
    %232 = arith.negf %231 : vector<1x128xf32>
    %233 = math.exp %232 : vector<1x128xf32>
    %cst_54 = arith.constant 1.000000e+00 : f32
    %234 = vector.broadcast %cst_54 : f32 to vector<1x128xf32>
    %235 = arith.addf %234, %233 : vector<1x128xf32>
    %236 = arith.divf %234, %235 : vector<1x128xf32>
    %237 = vector.extract_strided_slice %218 {offsets = [0, 256], sizes = [1, 128], strides = [1, 1]} : vector<1x384xf32> to vector<1x128xf32>
    %238 = vector.extract_strided_slice %220 {offsets = [0, 256], sizes = [1, 128], strides = [1, 1]} : vector<1x384xf32> to vector<1x128xf32>
    %239 = arith.addf %238, %3 : vector<1x128xf32>
    %240 = arith.mulf %228, %239 : vector<1x128xf32>
    %241 = arith.addf %237, %240 : vector<1x128xf32>
    %242 = math.tanh %241 : vector<1x128xf32>
    %cst_55 = arith.constant 1.000000e+00 : f32
    %243 = vector.broadcast %cst_55 : f32 to vector<1x128xf32>
    %244 = arith.subf %243, %236 : vector<1x128xf32>
    %245 = arith.mulf %244, %242 : vector<1x128xf32>
    %246 = arith.mulf %236, %212 : vector<1x128xf32>
    %247 = arith.addf %245, %246 : vector<1x128xf32>
    %248 = arith.index_cast %c6_i32 : i32 to index
    %c0_56 = arith.constant 0 : index
    %249 = vector.load %arg6[%248, %c0_56] : memref<8x128xf32, #tpu.memory_space<vmem>>, vector<1x128xf32>
    tpu.vector_store %arg6[%248, %c0_56], %247 {strides = array<i32>} : memref<8x128xf32, #tpu.memory_space<vmem>>, vector<1x128xf32>,
    %c7_i32 = arith.constant 7 : i32
    %250 = arith.index_cast %c7_i32 : i32 to index
    %c0_57 = arith.constant 0 : index
    %251 = vector.load %arg0[%250, %c0_57] : memref<8x128xbf16, #tpu.memory_space<vmem>>, vector<1x128xbf16>
    %cst_58 = arith.constant dense<0.000000e+00> : vector<1x384xf32>
    %252 = tpu.matmul %251, %0, %cst_58 {dimension_numbers = #tpu.dot_dimension_numbers<[1], [0], [0], [1], [0, 0, 1, 1], [], []>} : vector<1x128xbf16>, vector<128x384xbf16>, vector<1x384xf32> -> vector<1x384xf32>
    %253 = arith.addf %252, %2 : vector<1x384xf32>
    %254 = arith.truncf %247 : vector<1x128xf32> to vector<1x128xbf16>
    %cst_59 = arith.constant dense<0.000000e+00> : vector<1x384xf32>
    %255 = tpu.matmul %254, %1, %cst_59 {dimension_numbers = #tpu.dot_dimension_numbers<[1], [0], [0], [1], [0, 0, 1, 1], [], []>} : vector<1x128xbf16>, vector<128x384xbf16>, vector<1x384xf32> -> vector<1x384xf32>
    %256 = vector.extract_strided_slice %253 {offsets = [0, 0], sizes = [1, 128], strides = [1, 1]} : vector<1x384xf32> to vector<1x128xf32>
    %257 = vector.extract_strided_slice %255 {offsets = [0, 0], sizes = [1, 128], strides = [1, 1]} : vector<1x384xf32> to vector<1x128xf32>
    %258 = arith.addf %256, %257 : vector<1x128xf32>
    %259 = arith.negf %258 : vector<1x128xf32>
    %260 = math.exp %259 : vector<1x128xf32>
    %cst_60 = arith.constant 1.000000e+00 : f32
    %261 = vector.broadcast %cst_60 : f32 to vector<1x128xf32>
    %262 = arith.addf %261, %260 : vector<1x128xf32>
    %263 = arith.divf %261, %262 : vector<1x128xf32>
    %264 = vector.extract_strided_slice %253 {offsets = [0, 128], sizes = [1, 128], strides = [1, 1]} : vector<1x384xf32> to vector<1x128xf32>
    %265 = vector.extract_strided_slice %255 {offsets = [0, 128], sizes = [1, 128], strides = [1, 1]} : vector<1x384xf32> to vector<1x128xf32>
    %266 = arith.addf %264, %265 : vector<1x128xf32>
    %267 = arith.negf %266 : vector<1x128xf32>
    %268 = math.exp %267 : vector<1x128xf32>
    %cst_61 = arith.constant 1.000000e+00 : f32
    %269 = vector.broadcast %cst_61 : f32 to vector<1x128xf32>
    %270 = arith.addf %269, %268 : vector<1x128xf32>
    %271 = arith.divf %269, %270 : vector<1x128xf32>
    %272 = vector.extract_strided_slice %253 {offsets = [0, 256], sizes = [1, 128], strides = [1, 1]} : vector<1x384xf32> to vector<1x128xf32>
    %273 = vector.extract_strided_slice %255 {offsets = [0, 256], sizes = [1, 128], strides = [1, 1]} : vector<1x384xf32> to vector<1x128xf32>
    %274 = arith.addf %273, %3 : vector<1x128xf32>
    %275 = arith.mulf %263, %274 : vector<1x128xf32>
    %276 = arith.addf %272, %275 : vector<1x128xf32>
    %277 = math.tanh %276 : vector<1x128xf32>
    %cst_62 = arith.constant 1.000000e+00 : f32
    %278 = vector.broadcast %cst_62 : f32 to vector<1x128xf32>
    %279 = arith.subf %278, %271 : vector<1x128xf32>
    %280 = arith.mulf %279, %277 : vector<1x128xf32>
    %281 = arith.mulf %271, %247 : vector<1x128xf32>
    %282 = arith.addf %280, %281 : vector<1x128xf32>
    %283 = arith.index_cast %c7_i32 : i32 to index
    %c0_63 = arith.constant 0 : index
    %284 = vector.load %arg6[%283, %c0_63] : memref<8x128xf32, #tpu.memory_space<vmem>>, vector<1x128xf32>
    tpu.vector_store %arg6[%283, %c0_63], %282 {strides = array<i32>} : memref<8x128xf32, #tpu.memory_space<vmem>>, vector<1x128xf32>,
    %c8_i32 = arith.constant 8 : i32
    return
  }
}

</mosaic_0001>

<bundles_post_ra>
// kernel: tpu_custom_call.1
= control target key start
LH: loop header
LB: loop body
LE: loop exit
PB: predicated region body
PF: predicated region fallthrough
CT: control target
= control target key end

     0   :  { %11 = vsyncpa [#allocation3], 0  ;;  %s3807_s0 = inlined_call_operand.hbm [shape: bf16[8,128], index: 0, kind: input, shape index: {}]   ;;  %s3808_s1 = inlined_call_operand.vmem [shape: f32[1,128], index: 1, kind: input, shape index: {}]   ;;  %s3809_s2 = inlined_call_operand.hbm [shape: bf16[128,384], index: 2, kind: input, shape index: {}]   ;;  %s3810_s3 = inlined_call_operand.hbm [shape: bf16[128,384], index: 3, kind: input, shape index: {}]   ;;  %s3811_s4 = inlined_call_operand.vmem [shape: f32[1,384], index: 4, kind: input, shape index: {}]   ;;  %s3812_s5 = inlined_call_operand.vmem [shape: f32[1,128], index: 5, kind: input, shape index: {}]   ;;  %s3813_s6 = inlined_call_operand.hbm [shape: f32[8,128], index: 6, kind: output, shape index: {}]  }
   0x1   :  { %12 = vsyncpa [#allocation6], 0 }
   0x2   :  { %13 = vsyncpa [#allocation4], 0  ;;  %s2847_s21 = smov [#allocation5]   ;;  %s2753_s25 = scalar_lea.hbm %s3809_s2, 3072 }
   0x3   :  { %s31_s22 = sshll.u32 %s2847_s21, 4  ;;  %p2754_p0 = scmp.ne.s32.totalorder %s3809_s2, %s2753_s25  ;;  %s32_s22 = int_to_ptr.vmem [resolvable:$true] %s31_s22 }
   0x4   :  { %p2757_p1 = scmp.lt.u32.totalorder %s2753_s25, %s3809_s2 }
   0x6   :  { %p2759_p2 = pnand %p2757_p1, %p2754_p0 }
   0x8   :  { %2762 = shalt.err (!%p2759_p2)
}
   0x9   :  { %s2763_s30 = scalar_lea.vmem %s32_s22, 3072  ;;  %p2768_p4 = scmp.lt.s32.totalorder %s32_s22, %s32_s22 }
   0xa   :  { %p2764_p3 = scmp.ne.s32.totalorder %s32_s22, %s2763_s30  ;;  %p2769_p5 = scmp.lt.s32.totalorder %s2763_s30, %s2763_s30 }
   0xc   :  { %p2770_p6 = por %p2769_p5, %p2768_p4 }
   0xe   :  { %p2771_p7 = pnand %p2770_p6, %p2764_p3 }
  0x10   :  { %2774 = shalt.err (!%p2771_p7)
}
  0x11   :  { %s2848_s7 = smov 192   ;;  %s2849_s8 = smov 12  }
  0x12   :  { %37 = dma.hbm_to_vmem [thread:$0]  %s3809_s2, 3072, %s32_s22, [#allocation6], %s2848_s7, %s2848_s7, %s2849_s8  }
  0x13   :  { %s2850_s11 = smov [#allocation2]   ;;  %s2851_s13 = smov [#allocation7]  }
  0x14   :  { %s20_s12 = sshll.u32 %s2850_s11, 4  ;;  %s43_s14 = sshll.u32 %s2851_s13, 4  ;;  %s21_s12 = int_to_ptr.vmem [resolvable:$true] %s20_s12  ;;  %s44_s14 = int_to_ptr.vmem [resolvable:$true] %s43_s14 }
  0x15   :  { %s2775_s17 = scalar_lea.hbm %s3807_s0, 64 }
  0x16   :  { %p2776_p8 = scmp.ne.s32.totalorder %s3807_s0, %s2775_s17  ;;  %p2779_p9 = scmp.lt.u32.totalorder %s2775_s17, %s3807_s0 }
  0x18   :  { %p2781_p10 = pnand %p2779_p9, %p2776_p8 }
  0x1a   :  { %2784 = shalt.err (!%p2781_p10)
}
  0x1b   :  { %s2785_s2 = scalar_lea.vmem %s21_s12, 64  ;;  %p2790_p12 = scmp.lt.s32.totalorder %s21_s12, %s21_s12 }
  0x1c   :  { %p2786_p11 = scmp.ne.s32.totalorder %s21_s12, %s2785_s2  ;;  %p2791_p13 = scmp.lt.s32.totalorder %s2785_s2, %s2785_s2 }
  0x1e   :  { %p2792_p0 = por %p2791_p13, %p2790_p12 }
  0x20   :  { %p2793_p1 = pnand %p2792_p0, %p2786_p11 }
  0x22   :  { %2796 = shalt.err (!%p2793_p1)
}
  0x23   :  { %23 = dma.hbm_to_vmem [thread:$0]  %s3807_s0, 64, %s21_s12, [#allocation3]  }
  0x24   :  { %s2797_s26 = scalar_lea.hbm %s3810_s3, 3072 }
  0x25   :  { %p2798_p2 = scmp.ne.s32.totalorder %s3810_s3, %s2797_s26  ;;  %p2801_p3 = scmp.lt.u32.totalorder %s2797_s26, %s3810_s3 }
  0x27   :  { %p2803_p4 = pnand %p2801_p3, %p2798_p2 }
  0x29   :  { %2806 = shalt.err (!%p2803_p4)
}
  0x2a   :  { %s2807_s9 = scalar_lea.vmem %s44_s14, 3072  ;;  %p2812_p6 = scmp.lt.s32.totalorder %s44_s14, %s44_s14 }
  0x2b   :  { %p2808_p5 = scmp.ne.s32.totalorder %s44_s14, %s2807_s9  ;;  %p2813_p7 = scmp.lt.s32.totalorder %s2807_s9, %s2807_s9 }
  0x2d   :  { %p2814_p8 = por %p2813_p7, %p2812_p6 }
  0x2f   :  { %p2815_p9 = pnand %p2814_p8, %p2808_p5 }
  0x31   :  { %2818 = shalt.err (!%p2815_p9)
}
  0x32   :  { %49 = dma.hbm_to_vmem [thread:$0]  %s3810_s3, 3072, %s44_s14, [#allocation6], %s2848_s7, %s2848_s7, %s2849_s8  }
  0x33   :  { %2841 = dma.done.wait [#allocation3], 64  }
  0x34   :  { %2842 = vsyncadd [#allocation3], 4294967232 }
  0x35   :  { %2843 = dma.done.wait [#allocation6], 6144  }
  0x36   :  { %2844 = vsyncadd [#allocation6], 4294961152  ;;  %v3816_v0 = vmov 0.0   ;;  %v3814_v1 = vmov 0   ;;  %vm2854_vm0 = vmmov 0   ;;  %v261_v59 = vlaneseq }
  0x37   :  { %2176 = vmatprep.subr.bf16.mxu1 %v3816_v0  ;;  %308 = vmatprep.mubr.bf16.mxu0 %v3814_v1  ;;  %v2937_v2 = vld [vmem:[#allocation5 + $0x4] ss:$12 sps:$4 sm:$0xff]   ;;  %v2939_v3 = vld [vmem:[#allocation5] ss:$12 sps:$4 sm:$0xff]   ;;  %v2942_v4 = vld [vmem:[#allocation5 + $0x1c] ss:$12 sps:$4 sm:$0xff]  }
  0x38   :  { %2192 = vmatprep.mubr.msk.bf16.mxu1 %vm2854_vm0, %v3816_v0  ;;  %3853 = vst [vmem:[#allocation12_spill] sm:$0xff] %v2937_v2  ;;  %276 = vmatprep.subr.bf16.mxu0 %v2937_v2  ;;  %v2945_v5 = vld [vmem:[#allocation5 + $0x18] ss:$12 sps:$4 sm:$0xff]   ;;  %v2948_v6 = vld [vmem:[#allocation5 + $0x34] ss:$12 sps:$4 sm:$0xff]   ;;  %v262_v60 = vshrl.u32 %v261_v59, 7 }
  0x39   :  { %277 = vmatpush1.bf16.msra.mxu0 %v2939_v3  ;;  %v2951_v7 = vld [vmem:[#allocation5 + $0x30] ss:$12 sps:$4 sm:$0xff]   ;;  %v2954_v8 = vld [vmem:[#allocation5 + $0x4c] ss:$12 sps:$4 sm:$0xff]   ;;  %v2956_v9 = vld [vmem:[#allocation5 + $0x8] ss:$12 sps:$4 sm:$0xff]  }
  0x3a   :  { %278 = vmatprep.subr.bf16.mxu0 %v2942_v4  ;;  %v2959_v10 = vld [vmem:[#allocation5 + $0x48] ss:$12 sps:$4 sm:$0xff]   ;;  %2177 = vmatpush3.bf16.msra.mxu1 %v2956_v9  ;;  %v2963_v11 = vld [vmem:[#allocation5 + $0x64] ss:$12 sps:$4 sm:$0xff]   ;;  %v2966_v12 = vld [vmem:[#allocation5 + $0x20] ss:$12 sps:$4 sm:$0xff]  }
  0x3b   :  { %2178 = vmatprep.subr.bf16.mxu1 %v3816_v0  ;;  %v2968_v13 = vld [vmem:[#allocation5 + $0x60] ss:$12 sps:$4 sm:$0xff]   ;;  %v2972_v14 = vld [vmem:[#allocation5 + $0x38] ss:$12 sps:$4 sm:$0xff]   ;;  %v2975_v15 = vld [vmem:[#allocation5 + $0x7c] ss:$12 sps:$4 sm:$0xff]  }
  0x3c   :  { %v2979_v16 = vld [vmem:[#allocation5 + $0x78] ss:$12 sps:$4 sm:$0xff]   ;;  %v2982_v17 = vld [vmem:[#allocation5 + $0x50] ss:$12 sps:$4 sm:$0xff]   ;;  %v2985_v18 = vld [vmem:[#allocation5 + $0x94] ss:$12 sps:$4 sm:$0xff]  }
  0x3d   :  { %279 = vmatpush1.bf16.msra.mxu0 %v2945_v5  ;;  %v2988_v19 = vld [vmem:[#allocation5 + $0x90] ss:$12 sps:$4 sm:$0xff]   ;;  %v2992_v20 = vld [vmem:[#allocation5 + $0x68] ss:$12 sps:$4 sm:$0xff]   ;;  %v2995_v21 = vld [vmem:[#allocation5 + $0xac] ss:$12 sps:$4 sm:$0xff]  }
  0x3e   :  { %280 = vmatprep.subr.bf16.mxu0 %v2948_v6  ;;  %2179 = vmatpush3.bf16.msra.mxu1 %v2966_v12  ;;  %v2998_v22 = vld [vmem:[#allocation5 + $0xa8] ss:$12 sps:$4 sm:$0xff]   ;;  %v3002_v23 = vld [vmem:[#allocation5 + $0x80] ss:$12 sps:$4 sm:$0xff]   ;;  %v3005_v24 = vld [vmem:[#allocation7 + $0x4] ss:$12 sps:$4 sm:$0xff]  }
  0x3f   :  { %2180 = vmatprep.subr.bf16.mxu1 %v3816_v0  ;;  %v131_v25 = vld [vmem:[#allocation2] sm:$0x1]  ;;  %v3009_v26 = vld [vmem:[#allocation7] ss:$12 sps:$4 sm:$0xff]   ;;  %v3012_v27 = vld [vmem:[#allocation5 + $0x98] ss:$12 sps:$4 sm:$0xff]  }
  0x40   :  { %v3015_v28 = vld [vmem:[#allocation7 + $0x1c] ss:$12 sps:$4 sm:$0xff]   ;;  %v3018_v29 = vld [vmem:[#allocation7 + $0x18] ss:$12 sps:$4 sm:$0xff]   ;;  %v3025_v31 = vld [vmem:[#allocation7 + $0x34] ss:$12 sps:$4 sm:$0xff]  }
  0x41   :  { %281 = vmatpush1.bf16.msra.mxu0 %v2951_v7  ;;  %v3022_v30 = vld [vmem:[#allocation5 + $0xb0] ss:$12 sps:$4 sm:$0xff]   ;;  %v3031_v33 = vld [vmem:[#allocation7 + $0x8] ss:$12 sps:$4 sm:$0xff]   ;;  %v3036_v34 = vld [vmem:[#allocation7 + $0x4c] ss:$12 sps:$4 sm:$0xff]  }
  0x42   :  { %282 = vmatprep.subr.bf16.mxu0 %v2954_v8  ;;  %2181 = vmatpush3.bf16.msra.mxu1 %v2972_v14  ;;  %v3028_v32 = vld [vmem:[#allocation7 + $0x30] ss:$12 sps:$4 sm:$0xff]   ;;  %v3040_v35 = vld [vmem:[#allocation7 + $0x48] ss:$12 sps:$4 sm:$0xff]   ;;  %v3043_v36 = vld [vmem:[#allocation7 + $0x20] ss:$12 sps:$4 sm:$0xff]  }
  0x43   :  { %2182 = vmatprep.subr.bf16.mxu1 %v3816_v0  ;;  %v3046_v37 = vld [vmem:[#allocation7 + $0x64] ss:$12 sps:$4 sm:$0xff]   ;;  %v3052_v38 = vld [vmem:[#allocation7 + $0x60] ss:$12 sps:$4 sm:$0xff]   ;;  %v3058_v40 = vld [vmem:[#allocation7 + $0x7c] ss:$12 sps:$4 sm:$0xff]  }
  0x44   :  { %v3055_v39 = vld [vmem:[#allocation7 + $0x38] ss:$12 sps:$4 sm:$0xff]   ;;  %v3065_v42 = vld [vmem:[#allocation7 + $0x50] ss:$12 sps:$4 sm:$0xff]   ;;  %v3068_v43 = vld [vmem:[#allocation7 + $0x94] ss:$12 sps:$4 sm:$0xff]  }
  0x45   :  { %283 = vmatpush1.bf16.msra.mxu0 %v2959_v10  ;;  %v3062_v41 = vld [vmem:[#allocation7 + $0x78] ss:$12 sps:$4 sm:$0xff]   ;;  %3855 = vst [vmem:[#allocation14_spill] sm:$0xff] %v3068_v43  ;;  %v3072_v44 = vld [vmem:[#allocation7 + $0x90] ss:$12 sps:$4 sm:$0xff]   ;;  %v263_v61 = vsub.s32 0, %v262_v60 }
  0x46   :  { %284 = vmatprep.subr.bf16.mxu0 %v2963_v11  ;;  %2183 = vmatpush3.bf16.msra.mxu1 %v2982_v17  ;;  %3854 = vst [vmem:[#allocation13_spill] sm:$0xff] %v3062_v41  ;;  %3856 = vst [vmem:[#allocation15_spill] sm:$0xff] %v3072_v44  ;;  %v3075_v45 = vld [vmem:[#allocation7 + $0x68] ss:$12 sps:$4 sm:$0xff]   ;;  %v3078_v46 = vld [vmem:[#allocation7 + $0xac] ss:$12 sps:$4 sm:$0xff]  }
  0x47   :  { %2184 = vmatprep.subr.bf16.mxu1 %v3816_v0  ;;  %3857 = vst [vmem:[#allocation16_spill] sm:$0xff] %v3078_v46  ;;  %v3082_v47 = vld [vmem:[#allocation7 + $0xa8] ss:$12 sps:$4 sm:$0xff]   ;;  %v3087_v48 = vld [vmem:[%s3808_s1] sm:$0x1]  ;;  %v267_v63 = vsub.s32 1, %v262_v60 }
  0x48   :  { %3858 = vst [vmem:[#allocation17_spill] sm:$0xff] %v3082_v47  ;;  %v3090_v49 = vld [vmem:[#allocation7 + $0x80] ss:$12 sps:$4 sm:$0xff]   ;;  %v357_v50 = vpack.c.bf16 %v3087_v48, %v3087_v48  ;;  %v3098_v51 = vld [vmem:[#allocation7 + $0x98] ss:$12 sps:$4 sm:$0xff]  }
  0x49   :  { %285 = vmatpush1.bf16.msra.mxu0 %v2968_v13  ;;  %3859 = vst [vmem:[#allocation18_spill] sm:$0xff] %v3090_v49  ;;  %3860 = vst [vmem:[#allocation19_spill] sm:$0xff] %v3098_v51  ;;  %v3103_v52 = vld [vmem:[#allocation7 + $0xb0] ss:$12 sps:$4 sm:$0xff]  }
  0x4a   :  { %286 = vmatprep.subr.bf16.mxu0 %v2975_v15  ;;  %2185 = vmatpush3.bf16.msra.mxu1 %v2992_v20  ;;  %3861 = vst [vmem:[#allocation20_spill] sm:$0xff] %v3103_v52  ;;  %v2617_v53 = vld [vmem:[#allocation2] ss:$0 sps:$4 sm:$0x11]  }
  0x4b   :  { %2186 = vmatprep.subr.bf16.mxu1 %v3816_v0  ;;  %v595_v54 = vshrl.u32 %v2617_v53, 16  ;;  %v128_v62 = vld [vmem:[%s3811_s4] sm:$0x7] }
  0x4c   :  { %v3183_v53 = vrot.slane %v128_v62, %v267_v63  ;;  %v271_v63 = vsub.s32 2, %v262_v60 }
  0x4d   :  { %287 = vmatpush1.bf16.msra.mxu0 %v2979_v16 }
  0x4e   :  { %288 = vmatprep.subr.bf16.mxu0 %v2985_v18  ;;  %2187 = vmatpush3.bf16.msra.mxu1 %v3002_v23 }
  0x4f   :  { %2188 = vmatprep.subr.bf16.mxu1 %v3816_v0 }
  0x51   :  { %289 = vmatpush1.bf16.msra.mxu0 %v2988_v19 }
  0x52   :  { %290 = vmatprep.subr.bf16.mxu0 %v2995_v21  ;;  %2189 = vmatpush3.bf16.msra.mxu1 %v3012_v27 }
  0x53   :  { %2190 = vmatprep.subr.bf16.mxu1 %v3816_v0 }
  0x55   :  { %291 = vmatpush1.bf16.msra.mxu0 %v2998_v22 }
  0x56   :  { %486 = vmatprep.subr.bf16.mxu0 %v3005_v24  ;;  %2191 = vmatpush3.bf16.msra.mxu1 %v3022_v30 }
  0x57   :  { %2196 = vmatprep.subr.bf16.mxu1 %v3816_v0 }
  0x58   :  { %309 = vmatmul.mubr.bf16.vlgmr.msra.gmra.mrb[0].mxu0 %v131_v25 }
  0x59   :  { %487 = vmatpush1.bf16.msra.mxu0 %v3009_v26  ;;  %518 = vmatprep.mubr.bf16.mxu0 %v3814_v1 }
  0x5a   :  { %488 = vmatprep.subr.bf16.mxu0 %v3015_v28  ;;  %2193 = vmatmul.mubr.bf16.vlgmr.msra.gmra.mrb[0].mxu1 %v131_v25  ;;  %v3181_v25 = vrot.slane %v128_v62, %v263_v61 }
  0x5b   :  { %2197 = vmatpush3.bf16.msra.mxu1 %v3031_v33  ;;  %2212 = vmatprep.mubr.msk.bf16.mxu1 %vm2854_vm0, %v3816_v0 }
  0x5c   :  { %2198 = vmatprep.subr.bf16.mxu1 %v3816_v0 }
  0x5d   :  { %489 = vmatpush1.bf16.msra.mxu0 %v3018_v29 }
  0x5e   :  { %490 = vmatprep.subr.bf16.mxu0 %v3025_v31 }
  0x5f   :  { %2199 = vmatpush3.bf16.msra.mxu1 %v3043_v36 }
  0x60   :  { %2200 = vmatprep.subr.bf16.mxu1 %v3816_v0 }
  0x61   :  { %491 = vmatpush1.bf16.msra.mxu0 %v3028_v32 }
  0x62   :  { %492 = vmatprep.subr.bf16.mxu0 %v3036_v34 }
  0x63   :  { %2201 = vmatpush3.bf16.msra.mxu1 %v3055_v39 }
  0x64   :  { %2202 = vmatprep.subr.bf16.mxu1 %v3816_v0 }
  0x65   :  { %493 = vmatpush1.bf16.msra.mxu0 %v3040_v35 }
  0x66   :  { %494 = vmatprep.subr.bf16.mxu0 %v3046_v37 }
  0x67   :  { %2203 = vmatpush3.bf16.msra.mxu1 %v3065_v42 }
  0x68   :  { %2204 = vmatprep.subr.bf16.mxu1 %v3816_v0 }
  0x69   :  { %495 = vmatpush1.bf16.msra.mxu0 %v3052_v38 }
  0x6a   :  { %496 = vmatprep.subr.bf16.mxu0 %v3058_v40 }
  0x6b   :  { %2205 = vmatpush3.bf16.msra.mxu1 %v3075_v45 }
  0x6c   :  { %2206 = vmatprep.subr.bf16.mxu1 %v3816_v0 }
  0x6d   :  { %497 = vmatpush1.bf16.msra.mxu0 %v3062_v41 }
  0x6e   :  { %498 = vmatprep.subr.bf16.mxu0 %v3068_v43 }
  0x6f   :  { %2207 = vmatpush3.bf16.msra.mxu1 %v3090_v49 }
  0x70   :  { %2208 = vmatprep.subr.bf16.mxu1 %v3816_v0 }
  0x71   :  { %499 = vmatpush1.bf16.msra.mxu0 %v3072_v44 }
  0x72   :  { %500 = vmatprep.subr.bf16.mxu0 %v3078_v46 }
  0x73   :  { %2209 = vmatpush3.bf16.msra.mxu1 %v3098_v51 }
  0x74   :  { %2210 = vmatprep.subr.bf16.mxu1 %v3816_v0 }
  0x75   :  { %501 = vmatpush1.bf16.msra.mxu0 %v3082_v47 }
  0x76   :  { %598 = vmatprep.subr.bf16.mxu0 %v2937_v2 }
  0x77   :  { %2211 = vmatpush3.bf16.msra.mxu1 %v3103_v52 }
  0x78   :  { %519 = vmatmul.mubr.bf16.vlgmr.msra.gmra.mrb[0].mxu0 %v357_v50  ;;  %2216 = vmatprep.subr.bf16.mxu1 %v3816_v0 }
  0x79   :  { %599 = vmatpush1.bf16.msra.mxu0 %v2939_v3  ;;  %630 = vmatprep.mubr.bf16.mxu0 %v3814_v1 }
  0x7a   :  { %600 = vmatprep.subr.bf16.mxu0 %v2942_v4  ;;  %2213 = vmatmul.mubr.bf16.vlgmr.msra.gmra.mrb[4].mxu1 %v357_v50 }
  0x7b   :  { %2217 = vmatpush3.bf16.msra.mxu1 %v2956_v9  ;;  %2232 = vmatprep.mubr.msk.bf16.mxu1 %vm2854_vm0, %v3816_v0 }
  0x7c   :  { %2218 = vmatprep.subr.bf16.mxu1 %v3816_v0 }
  0x7d   :  { %601 = vmatpush1.bf16.msra.mxu0 %v2945_v5 }
  0x7e   :  { %602 = vmatprep.subr.bf16.mxu0 %v2948_v6 }
  0x7f   :  { %2219 = vmatpush3.bf16.msra.mxu1 %v2966_v12 }
  0x80   :  { %2220 = vmatprep.subr.bf16.mxu1 %v3816_v0 }
  0x81   :  { %603 = vmatpush1.bf16.msra.mxu0 %v2951_v7 }
  0x82   :  { %604 = vmatprep.subr.bf16.mxu0 %v2954_v8 }
  0x83   :  { %2221 = vmatpush3.bf16.msra.mxu1 %v2972_v14 }
  0x84   :  { %2222 = vmatprep.subr.bf16.mxu1 %v3816_v0 }
  0x85   :  { %605 = vmatpush1.bf16.msra.mxu0 %v2959_v10 }
  0x86   :  { %606 = vmatprep.subr.bf16.mxu0 %v2963_v11 }
  0x87   :  { %2223 = vmatpush3.bf16.msra.mxu1 %v2982_v17 }
  0x88   :  { %2224 = vmatprep.subr.bf16.mxu1 %v3816_v0 }
  0x89   :  { %607 = vmatpush1.bf16.msra.mxu0 %v2968_v13 }
  0x8a   :  { %608 = vmatprep.subr.bf16.mxu0 %v2975_v15 }
  0x8b   :  { %2225 = vmatpush3.bf16.msra.mxu1 %v2992_v20 }
  0x8c   :  { %2226 = vmatprep.subr.bf16.mxu1 %v3816_v0 }
  0x8d   :  { %609 = vmatpush1.bf16.msra.mxu0 %v2979_v16 }
  0x8e   :  { %610 = vmatprep.subr.bf16.mxu0 %v2985_v18 }
  0x8f   :  { %2227 = vmatpush3.bf16.msra.mxu1 %v3002_v23 }
  0x90   :  { %2228 = vmatprep.subr.bf16.mxu1 %v3816_v0 }
  0x91   :  { %611 = vmatpush1.bf16.msra.mxu0 %v2988_v19 }
  0x92   :  { %612 = vmatprep.subr.bf16.mxu0 %v2995_v21 }
  0x93   :  { %2229 = vmatpush3.bf16.msra.mxu1 %v3012_v27 }
  0x94   :  { %2230 = vmatprep.subr.bf16.mxu1 %v3816_v0 }
  0x95   :  { %613 = vmatpush1.bf16.msra.mxu0 %v2998_v22 }
  0x96   :  { %680 = vmatprep.subr.bf16.mxu0 %v3005_v24 }
  0x97   :  { %2231 = vmatpush3.bf16.msra.mxu1 %v3022_v30 }
  0x98   :  { %2236 = vmatprep.subr.bf16.mxu1 %v3816_v0  ;;  %631 = vmatmul.mubr.bf16.vlgmr.msra.gmra.mrb[4].mxu0 %v595_v54 }
  0x99   :  { %681 = vmatpush1.bf16.msra.mxu0 %v3009_v26  ;;  %712 = vmatprep.mubr.bf16.mxu0 %v3814_v1 }
  0x9a   :  { %2233 = vmatmul.mubr.bf16.vlgmr.msra.gmra.mrb[8].mxu1 %v595_v54  ;;  %682 = vmatprep.subr.bf16.mxu0 %v3015_v28 }
  0x9b   :  { %2237 = vmatpush3.bf16.msra.mxu1 %v3031_v33  ;;  %2252 = vmatprep.mubr.msk.bf16.mxu1 %vm2854_vm0, %v3816_v0 }
  0x9c   :  { %2238 = vmatprep.subr.bf16.mxu1 %v3816_v0 }
  0x9d   :  { %683 = vmatpush1.bf16.msra.mxu0 %v3018_v29 }
  0x9e   :  { %684 = vmatprep.subr.bf16.mxu0 %v3025_v31 }
  0x9f   :  { %2239 = vmatpush3.bf16.msra.mxu1 %v3043_v36 }
  0xa0   :  { %2240 = vmatprep.subr.bf16.mxu1 %v3816_v0 }
  0xa1   :  { %685 = vmatpush1.bf16.msra.mxu0 %v3028_v32 }
  0xa2   :  { %686 = vmatprep.subr.bf16.mxu0 %v3036_v34 }
  0xa3   :  { %2241 = vmatpush3.bf16.msra.mxu1 %v3055_v39 }
  0xa4   :  { %2242 = vmatprep.subr.bf16.mxu1 %v3816_v0 }
  0xa5   :  { %687 = vmatpush1.bf16.msra.mxu0 %v3040_v35 }
  0xa6   :  { %688 = vmatprep.subr.bf16.mxu0 %v3046_v37 }
  0xa7   :  { %2243 = vmatpush3.bf16.msra.mxu1 %v3065_v42 }
  0xa8   :  { %2244 = vmatprep.subr.bf16.mxu1 %v3816_v0 }
  0xa9   :  { %689 = vmatpush1.bf16.msra.mxu0 %v3052_v38 }
  0xaa   :  { %690 = vmatprep.subr.bf16.mxu0 %v3058_v40 }
  0xab   :  { %2245 = vmatpush3.bf16.msra.mxu1 %v3075_v45 }
  0xac   :  { %2246 = vmatprep.subr.bf16.mxu1 %v3816_v0 }
  0xad   :  { %691 = vmatpush1.bf16.msra.mxu0 %v3062_v41 }
  0xae   :  { %692 = vmatprep.subr.bf16.mxu0 %v3068_v43 }
  0xaf   :  { %2247 = vmatpush3.bf16.msra.mxu1 %v3090_v49 }
  0xb0   :  { %2248 = vmatprep.subr.bf16.mxu1 %v3816_v0 }
  0xb1   :  { %693 = vmatpush1.bf16.msra.mxu0 %v3072_v44 }
  0xb2   :  { %694 = vmatprep.subr.bf16.mxu0 %v3078_v46 }
  0xb3   :  { %2249 = vmatpush3.bf16.msra.mxu1 %v3098_v51 }
  0xb4   :  { %2250 = vmatprep.subr.bf16.mxu1 %v3816_v0 }
  0xb5   :  { %695 = vmatpush1.bf16.msra.mxu0 %v3082_v47 }
  0xb6   :  { %790 = vmatprep.subr.bf16.mxu0 %v2937_v2 }
  0xb7   :  { %2251 = vmatpush3.bf16.msra.mxu1 %v3103_v52 }
  0xb8   :  { %2256 = vmatprep.subr.bf16.mxu1 %v3816_v0 }
 0x12d   :  { %v351_v55 = vpop.f32.mrb[0].mxu1 }
 0x12e   :  { %v2194_v56 = vpop.f32.mrb[1].mxu1 }
 0x12f   :  { %v354_v57 = vpop.f32.mrb[2].mxu1 }
 0x130   :  { %v2195_v58 = vpop.f32.mrb[3].mxu1 }
 0x14b   :  { %v520_v50 = vpop.f32.mrb[0].mxu0 }
 0x14c   :  { %v2496_v54 = vadd.f32 %v520_v50, %v3181_v25  ;;  %v522_v1 = vpop.f32.mrb[1].mxu0  ;;  %v3192_v50 = vrot.slane %v128_v62, %v271_v63 }
 0x14d   :  { %v524_v0 = vpop.f32.mrb[2].mxu0  ;;  %v2497_v58 = vadd.f32 %v522_v1, %v3183_v53  ;;  %v561_v2 = vpop.f32.mrb[4].mxu1 }
 0x14e   :  { %v2009_v56 = vmul.f32 -1.442695, %v2496_v54  ;;  %v525_v57 = vpop.f32.mrb[3].mxu0  ;;  %v2214_v52 = vpop.f32.mrb[5].mxu1  ;;  %v3190_v0 = vld [vmem:[%s3812_s5] sm:$0x1] }
 0x14f   :  { %v2010_v59 = vmul.f32 -1.442695, %v2497_v58  ;;  %v564_v47 = vpop.f32.mrb[6].mxu1  ;;  %v581_v54 = vadd.f32 %v561_v2, %v3190_v0 }
 0x150   :  { %2624 = vpow2.f32 %v2009_v56  ;;  %v2215_v46 = vpop.f32.mrb[7].mxu1  ;;  %v352_v47 = vadd.f32 %v351_v55, %v3192_v50  ;;  %v3863_v55 = vmov 0  }
 0x151   :  { %2626 = vpow2.f32 %v2010_v59 }
 0x15a   :  { %v2625_v61 = vpop.eup %2624 }
 0x15b   :  { %v571_v51 = vadd.f32 1.0, %v2625_v61  ;;  %v2627_v44 = vpop.eup %2626 }
 0x15c   :  { %v578_v1 = vadd.f32 1.0, %v2627_v44  ;;  %v3862_v44 = vmov 0.0  }
 0x15d   :  { %2628 = vrcp.f32 %v571_v51 }
 0x15e   :  { %2630 = vrcp.f32 %v578_v1 }
 0x167   :  { %v2629_v56 = vpop.eup %2628 }
 0x168   :  { %v582_v46 = vmul.f32 %v2629_v56, %v581_v54  ;;  %v2631_v51 = vpop.eup %2630  ;;  %v2618_v54 = vld [vmem:[#allocation2] ss:$0 sps:$4 sm:$0x22]  }
 0x169   :  { %v585_v60 = vsub.f32 1.0, %v2631_v51  ;;  %v587_v59 = vmul.f32 %v2631_v51, %v3087_v48  ;;  %v788_v56 = vrot.slane %v2618_v54, 1  ;;  %v3867_v51 = vld [vmem:[#allocation17_spill] sm:$0xff] }
 0x16a   :  { %v583_v52 = vadd.f32 %v582_v46, %v352_v47  ;;  %v3864_v47 = vld [vmem:[#allocation15_spill] sm:$0xff] }
 0x16b   :  { %v3865_v46 = vld [vmem:[#allocation19_spill] sm:$0xff] }
 0x16c   :  { %2632 = vtanh.f32 %v583_v52  ;;  %v3866_v52 = vld [vmem:[#allocation16_spill] sm:$0xff] }
 0x16d   :  { %v3237_v48 = vpop.f32.mrb[8].mxu1 }
 0x16e   :  { %v2234_v62 = vpop.f32.mrb[9].mxu1 }
 0x16f   :  { %v676_v63 = vpop.f32.mrb[10].mxu1 }
 0x170   :  { %v2235_v1 = vpop.f32.mrb[11].mxu1 }
 0x176   :  { %v2633_v57 = vpop.eup %2632 }
 0x177   :  { %v586_v58 = vmul.f32 %v2633_v57, %v585_v60  ;;  %v3868_v60 = vld [vmem:[#allocation20_spill] sm:$0xff] }
 0x178   :  { %v3869_v57 = vld [vmem:[#allocation12_spill] sm:$0xff] }
 0x179   :  { %v3197_v61 = vadd.f32 %v587_v59, %v586_v58 }
 0x17b   :  { %589 = vst [vmem:[#allocation8] sm:$0x1] %v3197_v61  ;;  %v679_v2 = vpack.c.bf16 %v3197_v61, %v3197_v61 }
 0x17d   :  { %713 = vmatmul.mubr.bf16.vlgmr.msra.gmra.mrb[4].mxu0 %v679_v2  ;;  %2253 = vmatmul.mubr.bf16.vlgmr.msra.gmra.mrb[12].mxu1 %v679_v2 }
 0x17e   :  { %791 = vmatpush1.bf16.msra.mxu0 %v2939_v3  ;;  %2257 = vmatpush3.bf16.msra.mxu1 %v2956_v9 }
 0x17f   :  { %792 = vmatprep.subr.bf16.mxu0 %v2942_v4  ;;  %2258 = vmatprep.subr.bf16.mxu1 %v3862_v44 }
 0x180   :  { %822 = vmatprep.mubr.bf16.mxu0 %v3863_v55  ;;  %2272 = vmatprep.mubr.msk.bf16.mxu1 %vm2854_vm0, %v3862_v44 }
 0x182   :  { %793 = vmatpush1.bf16.msra.mxu0 %v2945_v5  ;;  %2259 = vmatpush3.bf16.msra.mxu1 %v2966_v12 }
 0x183   :  { %794 = vmatprep.subr.bf16.mxu0 %v2948_v6  ;;  %2260 = vmatprep.subr.bf16.mxu1 %v3862_v44 }
 0x186   :  { %795 = vmatpush1.bf16.msra.mxu0 %v2951_v7  ;;  %2261 = vmatpush3.bf16.msra.mxu1 %v2972_v14 }
 0x187   :  { %796 = vmatprep.subr.bf16.mxu0 %v2954_v8  ;;  %2262 = vmatprep.subr.bf16.mxu1 %v3862_v44 }
 0x18a   :  { %797 = vmatpush1.bf16.msra.mxu0 %v2959_v10  ;;  %2263 = vmatpush3.bf16.msra.mxu1 %v2982_v17 }
 0x18b   :  { %798 = vmatprep.subr.bf16.mxu0 %v2963_v11  ;;  %2264 = vmatprep.subr.bf16.mxu1 %v3862_v44 }
 0x18e   :  { %799 = vmatpush1.bf16.msra.mxu0 %v2968_v13  ;;  %2265 = vmatpush3.bf16.msra.mxu1 %v2992_v20 }
 0x18f   :  { %800 = vmatprep.subr.bf16.mxu0 %v2975_v15  ;;  %2266 = vmatprep.subr.bf16.mxu1 %v3862_v44 }
 0x192   :  { %801 = vmatpush1.bf16.msra.mxu0 %v2979_v16  ;;  %2267 = vmatpush3.bf16.msra.mxu1 %v3002_v23 }
 0x193   :  { %802 = vmatprep.subr.bf16.mxu0 %v2985_v18  ;;  %2268 = vmatprep.subr.bf16.mxu1 %v3862_v44 }
 0x196   :  { %803 = vmatpush1.bf16.msra.mxu0 %v2988_v19  ;;  %2269 = vmatpush3.bf16.msra.mxu1 %v3012_v27 }
 0x197   :  { %804 = vmatprep.subr.bf16.mxu0 %v2995_v21  ;;  %2270 = vmatprep.subr.bf16.mxu1 %v3862_v44 }
 0x19a   :  { %805 = vmatpush1.bf16.msra.mxu0 %v2998_v22  ;;  %2271 = vmatpush3.bf16.msra.mxu1 %v3022_v30 }
 0x19b   :  { %872 = vmatprep.subr.bf16.mxu0 %v3005_v24  ;;  %2276 = vmatprep.subr.bf16.mxu1 %v3862_v44 }
 0x19d   :  { %823 = vmatmul.mubr.bf16.vlgmr.msra.gmra.mrb[8].mxu0 %v788_v56  ;;  %2273 = vmatmul.mubr.bf16.vlgmr.msra.gmra.mrb[16].mxu1 %v788_v56 }
 0x19e   :  { %873 = vmatpush1.bf16.msra.mxu0 %v3009_v26  ;;  %2277 = vmatpush3.bf16.msra.mxu1 %v3031_v33 }
 0x19f   :  { %874 = vmatprep.subr.bf16.mxu0 %v3015_v28  ;;  %2278 = vmatprep.subr.bf16.mxu1 %v3862_v44 }
 0x1a0   :  { %904 = vmatprep.mubr.bf16.mxu0 %v3863_v55  ;;  %2292 = vmatprep.mubr.msk.bf16.mxu1 %vm2854_vm0, %v3862_v44 }
 0x1a2   :  { %875 = vmatpush1.bf16.msra.mxu0 %v3018_v29  ;;  %2279 = vmatpush3.bf16.msra.mxu1 %v3043_v36 }
 0x1a3   :  { %876 = vmatprep.subr.bf16.mxu0 %v3025_v31  ;;  %2280 = vmatprep.subr.bf16.mxu1 %v3862_v44 }
 0x1a6   :  { %877 = vmatpush1.bf16.msra.mxu0 %v3028_v32  ;;  %2281 = vmatpush3.bf16.msra.mxu1 %v3055_v39 }
 0x1a7   :  { %878 = vmatprep.subr.bf16.mxu0 %v3036_v34  ;;  %2282 = vmatprep.subr.bf16.mxu1 %v3862_v44 }
 0x1aa   :  { %879 = vmatpush1.bf16.msra.mxu0 %v3040_v35  ;;  %2283 = vmatpush3.bf16.msra.mxu1 %v3065_v42 }
 0x1ab   :  { %880 = vmatprep.subr.bf16.mxu0 %v3046_v37  ;;  %2284 = vmatprep.subr.bf16.mxu1 %v3862_v44 }
 0x1ae   :  { %881 = vmatpush1.bf16.msra.mxu0 %v3052_v38  ;;  %2285 = vmatpush3.bf16.msra.mxu1 %v3075_v45 }
 0x1af   :  { %882 = vmatprep.subr.bf16.mxu0 %v3058_v40  ;;  %2286 = vmatprep.subr.bf16.mxu1 %v3862_v44 }
 0x1b2   :  { %883 = vmatpush1.bf16.msra.mxu0 %v3062_v41  ;;  %2287 = vmatpush3.bf16.msra.mxu1 %v3090_v49 }
 0x1b3   :  { %884 = vmatprep.subr.bf16.mxu0 %v3068_v43  ;;  %2288 = vmatprep.subr.bf16.mxu1 %v3862_v44 }
 0x1b6   :  { %885 = vmatpush1.bf16.msra.mxu0 %v3864_v47  ;;  %2289 = vmatpush3.bf16.msra.mxu1 %v3865_v46 }
 0x1b7   :  { %886 = vmatprep.subr.bf16.mxu0 %v3866_v52  ;;  %2290 = vmatprep.subr.bf16.mxu1 %v3862_v44 }
 0x1ba   :  { %887 = vmatpush1.bf16.msra.mxu0 %v3867_v51  ;;  %2291 = vmatpush3.bf16.msra.mxu1 %v3868_v60 }
 0x1bb   :  { %985 = vmatprep.subr.bf16.mxu0 %v3869_v57  ;;  %2296 = vmatprep.subr.bf16.mxu1 %v3862_v44 }
 0x250   :  { %v714_v58 = vpop.f32.mrb[4].mxu0  ;;  %v755_v59 = vpop.f32.mrb[12].mxu1 }
 0x251   :  { %v2498_v2 = vadd.f32 %v714_v58, %v3181_v25  ;;  %v716_v62 = vpop.f32.mrb[5].mxu0  ;;  %v2254_v63 = vpop.f32.mrb[13].mxu1  ;;  %v775_v41 = vadd.f32 %v755_v59, %v3190_v0  ;;  %v3878_v59 = vld [vmem:[#allocation12_spill] sm:$0xff] }
 0x252   :  { %v718_v1 = vpop.f32.mrb[6].mxu0  ;;  %v758_v54 = vpop.f32.mrb[14].mxu1  ;;  %v2499_v47 = vadd.f32 %v716_v62, %v3183_v53  ;;  %v674_v63 = vadd.f32 %v3237_v48, %v3192_v50  ;;  %v3876_v48 = vld [vmem:[#allocation17_spill] sm:$0xff] }
 0x253   :  { %v2012_v56 = vmul.f32 -1.442695, %v2498_v2  ;;  %v719_v52 = vpop.f32.mrb[7].mxu0  ;;  %v2255_v46 = vpop.f32.mrb[15].mxu1 }
 0x254   :  { %v2013_v51 = vmul.f32 -1.442695, %v2499_v47 }
 0x255   :  { %2634 = vpow2.f32 %v2012_v56 }
 0x256   :  { %2636 = vpow2.f32 %v2013_v51 }
 0x25f   :  { %v2635_v60 = vpop.eup %2634 }
 0x260   :  { %v765_v57 = vadd.f32 1.0, %v2635_v60  ;;  %v2637_v43 = vpop.eup %2636 }
 0x261   :  { %v772_v49 = vadd.f32 1.0, %v2637_v43 }
 0x262   :  { %2638 = vrcp.f32 %v765_v57  ;;  %v3877_v57 = vld [vmem:[#allocation20_spill] sm:$0xff] }
 0x263   :  { %2640 = vrcp.f32 %v772_v49  ;;  %v3874_v49 = vld [vmem:[#allocation19_spill] sm:$0xff] }
 0x26c   :  { %v2639_v58 = vpop.eup %2638 }
 0x26d   :  { %v776_v1 = vmul.f32 %v2639_v58, %v775_v41  ;;  %v2641_v46 = vpop.eup %2640  ;;  %v3873_v41 = vld [vmem:[#allocation15_spill] sm:$0xff] }
 0x26e   :  { %v779_v2 = vsub.f32 1.0, %v2641_v46  ;;  %v781_v51 = vmul.f32 %v2641_v46, %v3197_v61  ;;  %v3875_v61 = vld [vmem:[#allocation16_spill] sm:$0xff] }
 0x26f   :  { %v777_v52 = vadd.f32 %v776_v1, %v674_v63 }
 0x271   :  { %2642 = vtanh.f32 %v777_v52 }
 0x27b   :  { %v2643_v62 = vpop.eup %2642 }
 0x27c   :  { %v780_v47 = vmul.f32 %v2643_v62, %v779_v2 }
 0x27e   :  { %v3280_v60 = vadd.f32 %v781_v51, %v780_v47 }
 0x280   :  { %783 = vst [vmem:[#allocation8 + $0x1] sm:$0x1] %v3280_v60  ;;  %v871_v43 = vpack.c.bf16 %v3280_v60, %v3280_v60 }
 0x282   :  { %905 = vmatmul.mubr.bf16.vlgmr.msra.gmra.mrb[8].mxu0 %v871_v43  ;;  %2293 = vmatmul.mubr.bf16.vlgmr.msra.gmra.mrb[20].mxu1 %v871_v43 }
 0x283   :  { %986 = vmatpush1.bf16.msra.mxu0 %v2939_v3  ;;  %2297 = vmatpush3.bf16.msra.mxu1 %v2956_v9  ;;  %v3320_v3 = vpop.f32.mrb[16].mxu1 }
 0x284   :  { %987 = vmatprep.subr.bf16.mxu0 %v2942_v4  ;;  %2298 = vmatprep.subr.bf16.mxu1 %v3862_v44  ;;  %v2274_v4 = vpop.f32.mrb[17].mxu1 }
 0x285   :  { %1017 = vmatprep.mubr.bf16.mxu0 %v3863_v55  ;;  %2312 = vmatprep.mubr.msk.bf16.mxu1 %vm2854_vm0, %v3862_v44 }
 0x287   :  { %988 = vmatpush1.bf16.msra.mxu0 %v2945_v5  ;;  %2299 = vmatpush3.bf16.msra.mxu1 %v2966_v12  ;;  %v868_v5 = vpop.f32.mrb[18].mxu1 }
 0x288   :  { %989 = vmatprep.subr.bf16.mxu0 %v2948_v6  ;;  %2300 = vmatprep.subr.bf16.mxu1 %v3862_v44  ;;  %v2275_v6 = vpop.f32.mrb[19].mxu1 }
 0x28b   :  { %990 = vmatpush1.bf16.msra.mxu0 %v2951_v7  ;;  %2301 = vmatpush3.bf16.msra.mxu1 %v2972_v14  ;;  %v2619_v7 = vld [vmem:[#allocation2] ss:$0 sps:$4 sm:$0x22]  }
 0x28c   :  { %991 = vmatprep.subr.bf16.mxu0 %v2954_v8  ;;  %2302 = vmatprep.subr.bf16.mxu1 %v3862_v44  ;;  %v981_v8 = vshrl.u32 %v2619_v7, 16 }
 0x28e   :  { %v983_v9 = vrot.slane %v981_v8, 1 }
 0x28f   :  { %992 = vmatpush1.bf16.msra.mxu0 %v2959_v10  ;;  %2303 = vmatpush3.bf16.msra.mxu1 %v2982_v17  ;;  %v3870_v10 = vld [vmem:[#allocation13_spill] sm:$0xff] }
 0x290   :  { %993 = vmatprep.subr.bf16.mxu0 %v2963_v11  ;;  %2304 = vmatprep.subr.bf16.mxu1 %v3862_v44  ;;  %v3871_v11 = vld [vmem:[#allocation18_spill] sm:$0xff] }
 0x293   :  { %994 = vmatpush1.bf16.msra.mxu0 %v2968_v13  ;;  %2305 = vmatpush3.bf16.msra.mxu1 %v2992_v20  ;;  %v3872_v13 = vld [vmem:[#allocation14_spill] sm:$0xff] }
 0x294   :  { %995 = vmatprep.subr.bf16.mxu0 %v2975_v15  ;;  %2306 = vmatprep.subr.bf16.mxu1 %v3862_v44 }
 0x297   :  { %996 = vmatpush1.bf16.msra.mxu0 %v2979_v16  ;;  %2307 = vmatpush3.bf16.msra.mxu1 %v3002_v23 }
 0x298   :  { %997 = vmatprep.subr.bf16.mxu0 %v2985_v18  ;;  %2308 = vmatprep.subr.bf16.mxu1 %v3862_v44 }
 0x29b   :  { %998 = vmatpush1.bf16.msra.mxu0 %v2988_v19  ;;  %2309 = vmatpush3.bf16.msra.mxu1 %v3012_v27 }
 0x29c   :  { %999 = vmatprep.subr.bf16.mxu0 %v2995_v21  ;;  %2310 = vmatprep.subr.bf16.mxu1 %v3862_v44 }
 0x29f   :  { %1000 = vmatpush1.bf16.msra.mxu0 %v2998_v22  ;;  %2311 = vmatpush3.bf16.msra.mxu1 %v3022_v30 }
 0x2a0   :  { %1067 = vmatprep.subr.bf16.mxu0 %v3005_v24  ;;  %2316 = vmatprep.subr.bf16.mxu1 %v3862_v44 }
 0x2a2   :  { %1018 = vmatmul.mubr.bf16.vlgmr.msra.gmra.mrb[12].mxu0 %v983_v9  ;;  %2313 = vmatmul.mubr.bf16.vlgmr.msra.gmra.mrb[24].mxu1 %v983_v9 }
 0x2a3   :  { %1068 = vmatpush1.bf16.msra.mxu0 %v3009_v26  ;;  %2317 = vmatpush3.bf16.msra.mxu1 %v3031_v33 }
 0x2a4   :  { %1069 = vmatprep.subr.bf16.mxu0 %v3015_v28  ;;  %2318 = vmatprep.subr.bf16.mxu1 %v3862_v44 }
 0x2a5   :  { %1099 = vmatprep.mubr.bf16.mxu0 %v3863_v55  ;;  %2332 = vmatprep.mubr.msk.bf16.mxu1 %vm2854_vm0, %v3862_v44 }
 0x2a7   :  { %1070 = vmatpush1.bf16.msra.mxu0 %v3018_v29  ;;  %2319 = vmatpush3.bf16.msra.mxu1 %v3043_v36 }
 0x2a8   :  { %1071 = vmatprep.subr.bf16.mxu0 %v3025_v31  ;;  %2320 = vmatprep.subr.bf16.mxu1 %v3862_v44 }
 0x2ab   :  { %1072 = vmatpush1.bf16.msra.mxu0 %v3028_v32  ;;  %2321 = vmatpush3.bf16.msra.mxu1 %v3055_v39 }
 0x2ac   :  { %1073 = vmatprep.subr.bf16.mxu0 %v3036_v34  ;;  %2322 = vmatprep.subr.bf16.mxu1 %v3862_v44 }
 0x2af   :  { %1074 = vmatpush1.bf16.msra.mxu0 %v3040_v35  ;;  %2323 = vmatpush3.bf16.msra.mxu1 %v3065_v42 }
 0x2b0   :  { %1075 = vmatprep.subr.bf16.mxu0 %v3046_v37  ;;  %2324 = vmatprep.subr.bf16.mxu1 %v3862_v44 }
 0x2b3   :  { %1076 = vmatpush1.bf16.msra.mxu0 %v3052_v38  ;;  %2325 = vmatpush3.bf16.msra.mxu1 %v3075_v45 }
 0x2b4   :  { %1077 = vmatprep.subr.bf16.mxu0 %v3058_v40  ;;  %2326 = vmatprep.subr.bf16.mxu1 %v3862_v44 }
 0x2b7   :  { %1078 = vmatpush1.bf16.msra.mxu0 %v3870_v10  ;;  %2327 = vmatpush3.bf16.msra.mxu1 %v3871_v11 }
 0x2b8   :  { %1079 = vmatprep.subr.bf16.mxu0 %v3872_v13  ;;  %2328 = vmatprep.subr.bf16.mxu1 %v3862_v44 }
 0x2bb   :  { %1080 = vmatpush1.bf16.msra.mxu0 %v3873_v41  ;;  %2329 = vmatpush3.bf16.msra.mxu1 %v3874_v49 }
 0x2bc   :  { %1081 = vmatprep.subr.bf16.mxu0 %v3875_v61  ;;  %2330 = vmatprep.subr.bf16.mxu1 %v3862_v44 }
 0x2bf   :  { %1082 = vmatpush1.bf16.msra.mxu0 %v3876_v48  ;;  %2331 = vmatpush3.bf16.msra.mxu1 %v3877_v57 }
 0x2c0   :  { %1177 = vmatprep.subr.bf16.mxu0 %v3878_v59  ;;  %2336 = vmatprep.subr.bf16.mxu1 %v3862_v44  ;;  %v866_v59 = vadd.f32 %v3320_v3, %v3192_v50  ;;  %v3368_v3 = vld [vmem:[#allocation5] ss:$12 sps:$4 sm:$0xff]  }
 0x355   :  { %v906_v54 = vpop.f32.mrb[8].mxu0  ;;  %v947_v56 = vpop.f32.mrb[20].mxu1 }
 0x356   :  { %v2500_v58 = vadd.f32 %v906_v54, %v3181_v25  ;;  %v908_v63 = vpop.f32.mrb[9].mxu0  ;;  %v2294_v1 = vpop.f32.mrb[21].mxu1  ;;  %v967_v8 = vadd.f32 %v947_v56, %v3190_v0 }
 0x357   :  { %v910_v52 = vpop.f32.mrb[10].mxu0  ;;  %v950_v46 = vpop.f32.mrb[22].mxu1  ;;  %v2501_v51 = vadd.f32 %v908_v63, %v3183_v53 }
 0x358   :  { %v2015_v2 = vmul.f32 -1.442695, %v2500_v58  ;;  %v911_v62 = vpop.f32.mrb[11].mxu0  ;;  %v2295_v47 = vpop.f32.mrb[23].mxu1 }
 0x359   :  { %v2016_v43 = vmul.f32 -1.442695, %v2501_v51  ;;  %v3371_v47 = vld [vmem:[#allocation5 + $0x8] ss:$12 sps:$4 sm:$0xff]  }
 0x35a   :  { %2644 = vpow2.f32 %v2015_v2  ;;  %v3374_v51 = vld [vmem:[#allocation5 + $0x1c] ss:$12 sps:$4 sm:$0xff]  }
 0x35b   :  { %2646 = vpow2.f32 %v2016_v43  ;;  %v3385_v43 = vld [vmem:[#allocation5 + $0x34] ss:$12 sps:$4 sm:$0xff]  }
 0x364   :  { %v2645_v4 = vpop.eup %2644 }
 0x365   :  { %v957_v5 = vadd.f32 1.0, %v2645_v4  ;;  %v2647_v6 = vpop.eup %2646  ;;  %v3389_v4 = vld [vmem:[#allocation5 + $0x30] ss:$12 sps:$4 sm:$0xff]  }
 0x366   :  { %v964_v7 = vadd.f32 1.0, %v2647_v6  ;;  %v3397_v6 = vld [vmem:[#allocation5 + $0x48] ss:$12 sps:$4 sm:$0xff]  }
 0x367   :  { %2648 = vrcp.f32 %v957_v5  ;;  %v3393_v5 = vld [vmem:[#allocation5 + $0x4c] ss:$12 sps:$4 sm:$0xff]  }
 0x368   :  { %2650 = vrcp.f32 %v964_v7  ;;  %v3405_v7 = vld [vmem:[#allocation5 + $0x60] ss:$12 sps:$4 sm:$0xff]  }
 0x371   :  { %v2649_v9 = vpop.eup %2648 }
 0x372   :  { %v968_v54 = vmul.f32 %v2649_v9, %v967_v8  ;;  %v2651_v1 = vpop.eup %2650  ;;  %v3487_v8 = vld [vmem:[#allocation5 + $0x38] ss:$12 sps:$4 sm:$0xff]   ;;  %v3493_v9 = vld [vmem:[#allocation5 + $0x50] ss:$12 sps:$4 sm:$0xff]  }
 0x373   :  { %v971_v63 = vsub.f32 1.0, %v2651_v1  ;;  %v973_v2 = vmul.f32 %v2651_v1, %v3280_v60  ;;  %v3381_v60 = vld [vmem:[#allocation5 + $0x18] ss:$12 sps:$4 sm:$0xff]   ;;  %v3509_v1 = vld [vmem:[#allocation5 + $0x80] ss:$12 sps:$4 sm:$0xff]  }
 0x374   :  { %v969_v58 = vadd.f32 %v968_v54, %v866_v59  ;;  %v3499_v59 = vld [vmem:[#allocation5 + $0x68] ss:$12 sps:$4 sm:$0xff]  }
 0x375   :  { %v3502_v54 = vld [vmem:[#allocation5 + $0x7c] ss:$12 sps:$4 sm:$0xff]  }
 0x376   :  { %2652 = vtanh.f32 %v969_v58  ;;  %v3506_v58 = vld [vmem:[#allocation5 + $0x78] ss:$12 sps:$4 sm:$0xff]  }
 0x380   :  { %v2653_v52 = vpop.eup %2652 }
 0x381   :  { %v972_v46 = vmul.f32 %v2653_v52, %v971_v63  ;;  %v3512_v63 = vld [vmem:[#allocation5 + $0x94] ss:$12 sps:$4 sm:$0xff]   ;;  %v3516_v52 = vld [vmem:[#allocation5 + $0x90] ss:$12 sps:$4 sm:$0xff]  }
 0x383   :  { %v3363_v62 = vadd.f32 %v973_v2, %v972_v46  ;;  %v3519_v46 = vld [vmem:[#allocation5 + $0x98] ss:$12 sps:$4 sm:$0xff]  }
 0x384   :  { %v3522_v2 = vld [vmem:[#allocation5 + $0xac] ss:$12 sps:$4 sm:$0xff]  }
 0x385   :  { %975 = vst [vmem:[#allocation8 + $0x2] sm:$0x1] %v3363_v62  ;;  %v1066_v56 = vpack.c.bf16 %v3363_v62, %v3363_v62 }
 0x387   :  { %1100 = vmatmul.mubr.bf16.vlgmr.msra.gmra.mrb[12].mxu0 %v1066_v56  ;;  %2333 = vmatmul.mubr.bf16.vlgmr.msra.gmra.mrb[28].mxu1 %v1066_v56  ;;  %v3529_v56 = vld [vmem:[#allocation5 + $0xb0] ss:$12 sps:$4 sm:$0xff]  }
 0x388   :  { %1178 = vmatpush1.bf16.msra.mxu0 %v3368_v3  ;;  %2337 = vmatpush3.bf16.msra.mxu1 %v3371_v47 }
 0x389   :  { %1179 = vmatprep.subr.bf16.mxu0 %v3374_v51  ;;  %2338 = vmatprep.subr.bf16.mxu1 %v3862_v44 }
 0x38a   :  { %1209 = vmatprep.mubr.bf16.mxu0 %v3863_v55  ;;  %2352 = vmatprep.mubr.msk.bf16.mxu1 %vm2854_vm0, %v3862_v44 }
 0x38c   :  { %1180 = vmatpush1.bf16.msra.mxu0 %v3381_v60  ;;  %2339 = vmatpush3.bf16.msra.mxu1 %v2966_v12  ;;  %v3401_v12 = vld [vmem:[#allocation5 + $0x64] ss:$12 sps:$4 sm:$0xff]  }
 0x38d   :  { %1181 = vmatprep.subr.bf16.mxu0 %v3385_v43  ;;  %2340 = vmatprep.subr.bf16.mxu1 %v3862_v44 }
 0x390   :  { %1182 = vmatpush1.bf16.msra.mxu0 %v3389_v4  ;;  %2341 = vmatpush3.bf16.msra.mxu1 %v2972_v14  ;;  %v3423_v14 = vpop.f32.mrb[24].mxu1 }
 0x391   :  { %1183 = vmatprep.subr.bf16.mxu0 %v3393_v5  ;;  %2342 = vmatprep.subr.bf16.mxu1 %v3862_v44 }
 0x394   :  { %1184 = vmatpush1.bf16.msra.mxu0 %v3397_v6  ;;  %2343 = vmatpush3.bf16.msra.mxu1 %v2982_v17 }
 0x395   :  { %1185 = vmatprep.subr.bf16.mxu0 %v3401_v12  ;;  %2344 = vmatprep.subr.bf16.mxu1 %v3862_v44 }
 0x398   :  { %1186 = vmatpush1.bf16.msra.mxu0 %v3405_v7  ;;  %2345 = vmatpush3.bf16.msra.mxu1 %v2992_v20  ;;  %v3458_v20 = vld [vmem:[#allocation5 + $0x4] ss:$12 sps:$4 sm:$0xff]  }
 0x399   :  { %1187 = vmatprep.subr.bf16.mxu0 %v2975_v15  ;;  %2346 = vmatprep.subr.bf16.mxu1 %v3862_v44  ;;  %v2314_v15 = vpop.f32.mrb[25].mxu1  ;;  %3879 = vst [vmem:[#allocation13_spill] sm:$0xff] %v3458_v20 }
 0x39c   :  { %1188 = vmatpush1.bf16.msra.mxu0 %v2979_v16  ;;  %2347 = vmatpush3.bf16.msra.mxu1 %v3002_v23  ;;  %v1063_v16 = vpop.f32.mrb[26].mxu1 }
 0x39d   :  { %1189 = vmatprep.subr.bf16.mxu0 %v2985_v18  ;;  %2348 = vmatprep.subr.bf16.mxu1 %v3862_v44  ;;  %v2315_v17 = vpop.f32.mrb[27].mxu1  ;;  %v2620_v18 = vld [vmem:[#allocation2] ss:$0 sps:$4 sm:$0x44]  }
 0x3a0   :  { %1190 = vmatpush1.bf16.msra.mxu0 %v2988_v19  ;;  %2349 = vmatpush3.bf16.msra.mxu1 %v3012_v27  ;;  %v1175_v19 = vrot.slane %v2620_v18, 2 }
 0x3a1   :  { %1191 = vmatprep.subr.bf16.mxu0 %v2995_v21  ;;  %2350 = vmatprep.subr.bf16.mxu1 %v3862_v44 }
 0x3a4   :  { %1192 = vmatpush1.bf16.msra.mxu0 %v2998_v22  ;;  %2351 = vmatpush3.bf16.msra.mxu1 %v3022_v30 }
 0x3a5   :  { %1259 = vmatprep.subr.bf16.mxu0 %v3005_v24  ;;  %2356 = vmatprep.subr.bf16.mxu1 %v3862_v44 }
 0x3a7   :  { %1210 = vmatmul.mubr.bf16.vlgmr.msra.gmra.mrb[16].mxu0 %v1175_v19  ;;  %2353 = vmatmul.mubr.bf16.vlgmr.msra.gmra.mrb[32].mxu1 %v1175_v19  ;;  %v2621_v19 = vld [vmem:[#allocation2] ss:$0 sps:$4 sm:$0x44]  }
 0x3a8   :  { %1260 = vmatpush1.bf16.msra.mxu0 %v3009_v26  ;;  %2357 = vmatpush3.bf16.msra.mxu1 %v3031_v33 }
 0x3a9   :  { %1261 = vmatprep.subr.bf16.mxu0 %v3015_v28  ;;  %2358 = vmatprep.subr.bf16.mxu1 %v3862_v44 }
 0x3aa   :  { %1291 = vmatprep.mubr.bf16.mxu0 %v3863_v55  ;;  %2372 = vmatprep.mubr.msk.bf16.mxu1 %vm2854_vm0, %v3862_v44 }
 0x3ac   :  { %1262 = vmatpush1.bf16.msra.mxu0 %v3018_v29  ;;  %2359 = vmatpush3.bf16.msra.mxu1 %v3043_v36 }
 0x3ad   :  { %1263 = vmatprep.subr.bf16.mxu0 %v3025_v31  ;;  %2360 = vmatprep.subr.bf16.mxu1 %v3862_v44 }
 0x3b0   :  { %1264 = vmatpush1.bf16.msra.mxu0 %v3028_v32  ;;  %2361 = vmatpush3.bf16.msra.mxu1 %v3055_v39 }
 0x3b1   :  { %1265 = vmatprep.subr.bf16.mxu0 %v3036_v34  ;;  %2362 = vmatprep.subr.bf16.mxu1 %v3862_v44 }
 0x3b4   :  { %1266 = vmatpush1.bf16.msra.mxu0 %v3040_v35  ;;  %2363 = vmatpush3.bf16.msra.mxu1 %v3065_v42 }
 0x3b5   :  { %1267 = vmatprep.subr.bf16.mxu0 %v3046_v37  ;;  %2364 = vmatprep.subr.bf16.mxu1 %v3862_v44 }
 0x3b8   :  { %1268 = vmatpush1.bf16.msra.mxu0 %v3052_v38  ;;  %2365 = vmatpush3.bf16.msra.mxu1 %v3075_v45 }
 0x3b9   :  { %1269 = vmatprep.subr.bf16.mxu0 %v3058_v40  ;;  %2366 = vmatprep.subr.bf16.mxu1 %v3862_v44  ;;  %v1061_v40 = vadd.f32 %v3423_v14, %v3192_v50  ;;  %v3532_v14 = vld [vmem:[#allocation7 + $0x4] ss:$12 sps:$4 sm:$0xff]  }
 0x3bc   :  { %1270 = vmatpush1.bf16.msra.mxu0 %v3870_v10  ;;  %2367 = vmatpush3.bf16.msra.mxu1 %v3871_v11 }
 0x3bd   :  { %1271 = vmatprep.subr.bf16.mxu0 %v3872_v13  ;;  %2368 = vmatprep.subr.bf16.mxu1 %v3862_v44 }
 0x3c0   :  { %1272 = vmatpush1.bf16.msra.mxu0 %v3873_v41  ;;  %2369 = vmatpush3.bf16.msra.mxu1 %v3874_v49 }
 0x3c1   :  { %1273 = vmatprep.subr.bf16.mxu0 %v3875_v61  ;;  %2370 = vmatprep.subr.bf16.mxu1 %v3862_v44 }
 0x3c4   :  { %1274 = vmatpush1.bf16.msra.mxu0 %v3876_v48  ;;  %2371 = vmatpush3.bf16.msra.mxu1 %v3877_v57  ;;  %v3481_v57 = vld [vmem:[#allocation5 + $0x20] ss:$12 sps:$4 sm:$0xff]  }
 0x3c5   :  { %1372 = vmatprep.subr.bf16.mxu0 %v3458_v20  ;;  %2376 = vmatprep.subr.bf16.mxu1 %v3862_v44 }
 0x45a   :  { %v1101_v21 = vpop.f32.mrb[12].mxu0  ;;  %v1142_v22 = vpop.f32.mrb[28].mxu1 }
 0x45b   :  { %v2502_v23 = vadd.f32 %v1101_v21, %v3181_v25  ;;  %v1103_v24 = vpop.f32.mrb[13].mxu0  ;;  %v2334_v26 = vpop.f32.mrb[29].mxu1  ;;  %v1162_v38 = vadd.f32 %v1142_v22, %v3190_v0  ;;  %v1368_v21 = vshrl.u32 %v2621_v19, 16 }
 0x45c   :  { %v1105_v27 = vpop.f32.mrb[14].mxu0  ;;  %v1145_v28 = vpop.f32.mrb[30].mxu1  ;;  %v2503_v32 = vadd.f32 %v1103_v24, %v3183_v53  ;;  %v3541_v24 = vld [vmem:[#allocation7 + $0x8] ss:$12 sps:$4 sm:$0xff]  }
 0x45d   :  { %v2018_v29 = vmul.f32 -1.442695, %v2502_v23  ;;  %v1106_v30 = vpop.f32.mrb[15].mxu0  ;;  %v2335_v31 = vpop.f32.mrb[31].mxu1  ;;  %v1370_v22 = vrot.slane %v1368_v21, 2 }
 0x45e   :  { %v2019_v33 = vmul.f32 -1.442695, %v2503_v32  ;;  %v3538_v23 = vld [vmem:[#allocation7] ss:$12 sps:$4 sm:$0xff]   ;;  %v3544_v26 = vld [vmem:[#allocation7 + $0x1c] ss:$12 sps:$4 sm:$0xff]  }
 0x45f   :  { %2654 = vpow2.f32 %v2018_v29  ;;  %v3551_v27 = vld [vmem:[#allocation7 + $0x18] ss:$12 sps:$4 sm:$0xff]   ;;  %v3554_v28 = vld [vmem:[#allocation7 + $0x20] ss:$12 sps:$4 sm:$0xff]   ;;  %v3561_v30 = vld [vmem:[#allocation7 + $0x30] ss:$12 sps:$4 sm:$0xff]  }
 0x460   :  { %2656 = vpow2.f32 %v2019_v33  ;;  %v3557_v29 = vld [vmem:[#allocation7 + $0x34] ss:$12 sps:$4 sm:$0xff]   ;;  %v3564_v31 = vld [vmem:[#allocation7 + $0x38] ss:$12 sps:$4 sm:$0xff]  }
 0x461   :  { %v3567_v32 = vld [vmem:[#allocation7 + $0x4c] ss:$12 sps:$4 sm:$0xff]   ;;  %v3571_v33 = vld [vmem:[#allocation7 + $0x48] ss:$12 sps:$4 sm:$0xff]  }
 0x469   :  { %v2655_v34 = vpop.eup %2654 }
 0x46a   :  { %v1152_v35 = vadd.f32 1.0, %v2655_v34  ;;  %v2657_v36 = vpop.eup %2656  ;;  %v3574_v34 = vld [vmem:[#allocation7 + $0x50] ss:$12 sps:$4 sm:$0xff]  }
 0x46b   :  { %v1159_v37 = vadd.f32 1.0, %v2657_v36  ;;  %v3581_v36 = vld [vmem:[#allocation7 + $0x60] ss:$12 sps:$4 sm:$0xff]  }
 0x46c   :  { %2658 = vrcp.f32 %v1152_v35  ;;  %v3577_v35 = vld [vmem:[#allocation7 + $0x64] ss:$12 sps:$4 sm:$0xff]  }
 0x46d   :  { %2660 = vrcp.f32 %v1159_v37  ;;  %v3584_v37 = vld [vmem:[#allocation7 + $0x68] ss:$12 sps:$4 sm:$0xff]  }
 0x476   :  { %v2659_v39 = vpop.eup %2658 }
 0x477   :  { %v1163_v42 = vmul.f32 %v2659_v39, %v1162_v38  ;;  %v2661_v10 = vpop.eup %2660  ;;  %v3587_v38 = vld [vmem:[#allocation7 + $0x7c] ss:$12 sps:$4 sm:$0xff]   ;;  %v3591_v39 = vld [vmem:[#allocation7 + $0x78] ss:$12 sps:$4 sm:$0xff]  }
 0x478   :  { %v1166_v11 = vsub.f32 1.0, %v2661_v10  ;;  %v1168_v49 = vmul.f32 %v2661_v10, %v3363_v62  ;;  %v3526_v62 = vld [vmem:[#allocation5 + $0xa8] ss:$12 sps:$4 sm:$0xff]   ;;  %3880 = vst [vmem:[#allocation18_spill] sm:$0xff] %v3591_v39  ;;  %v3604_v10 = vld [vmem:[#allocation7 + $0x98] ss:$12 sps:$4 sm:$0xff]  }
 0x479   :  { %v1164_v45 = vadd.f32 %v1163_v42, %v1061_v40  ;;  %v3594_v40 = vld [vmem:[#allocation7 + $0x80] ss:$12 sps:$4 sm:$0xff]   ;;  %3884 = vst [vmem:[#allocation16_spill] sm:$0xff] %v3604_v10 }
 0x47a   :  { %v3536_v15 = vpop.f32.mrb[32].mxu1  ;;  %3881 = vst [vmem:[#allocation14_spill] sm:$0xff] %v3594_v40  ;;  %v3597_v42 = vld [vmem:[#allocation7 + $0x94] ss:$12 sps:$4 sm:$0xff]  }
 0x47b   :  { %2662 = vtanh.f32 %v1164_v45  ;;  %v2354_v16 = vpop.f32.mrb[33].mxu1  ;;  %3882 = vst [vmem:[#allocation15_spill] sm:$0xff] %v3597_v42  ;;  %v3601_v45 = vld [vmem:[#allocation7 + $0x90] ss:$12 sps:$4 sm:$0xff]  }
 0x47c   :  { %v1255_v17 = vpop.f32.mrb[34].mxu1  ;;  %3883 = vst [vmem:[#allocation19_spill] sm:$0xff] %v3601_v45 }
 0x47d   :  { %v2355_v18 = vpop.f32.mrb[35].mxu1 }
 0x485   :  { %v2663_v13 = vpop.eup %2662 }
 0x486   :  { %v1167_v41 = vmul.f32 %v2663_v13, %v1166_v11  ;;  %v3607_v11 = vld [vmem:[#allocation7 + $0xac] ss:$12 sps:$4 sm:$0xff]   ;;  %v3611_v13 = vld [vmem:[#allocation7 + $0xa8] ss:$12 sps:$4 sm:$0xff]  }
 0x487   :  { %3885 = vst [vmem:[#allocation17_spill] sm:$0xff] %v3607_v11  ;;  %3886 = vst [vmem:[#allocation20_spill] sm:$0xff] %v3611_v13 }
 0x488   :  { %v3468_v61 = vadd.f32 %v1168_v49, %v1167_v41  ;;  %v3614_v41 = vld [vmem:[#allocation7 + $0xb0] ss:$12 sps:$4 sm:$0xff]  }
 0x489   :  { %3887 = vst [vmem:[#allocation12_spill] sm:$0xff] %v3614_v41 }
 0x48a   :  { %1170 = vst [vmem:[#allocation8 + $0x3] sm:$0x1] %v3468_v61  ;;  %v1258_v48 = vpack.c.bf16 %v3468_v61, %v3468_v61 }
 0x48c   :  { %1292 = vmatmul.mubr.bf16.vlgmr.msra.gmra.mrb[16].mxu0 %v1258_v48  ;;  %2373 = vmatmul.mubr.bf16.vlgmr.msra.gmra.mrb[36].mxu1 %v1258_v48 }
 0x48d   :  { %1373 = vmatpush1.bf16.msra.mxu0 %v3368_v3  ;;  %2377 = vmatpush3.bf16.msra.mxu1 %v3371_v47 }
 0x48e   :  { %1374 = vmatprep.subr.bf16.mxu0 %v3374_v51  ;;  %2378 = vmatprep.subr.bf16.mxu1 %v3862_v44 }
 0x48f   :  { %1404 = vmatprep.mubr.bf16.mxu0 %v3863_v55  ;;  %2392 = vmatprep.mubr.msk.bf16.mxu1 %vm2854_vm0, %v3862_v44 }
 0x491   :  { %1375 = vmatpush1.bf16.msra.mxu0 %v3381_v60  ;;  %2379 = vmatpush3.bf16.msra.mxu1 %v3481_v57 }
 0x492   :  { %1376 = vmatprep.subr.bf16.mxu0 %v3385_v43  ;;  %2380 = vmatprep.subr.bf16.mxu1 %v3862_v44 }
 0x495   :  { %1377 = vmatpush1.bf16.msra.mxu0 %v3389_v4  ;;  %2381 = vmatpush3.bf16.msra.mxu1 %v3487_v8 }
 0x496   :  { %1378 = vmatprep.subr.bf16.mxu0 %v3393_v5  ;;  %2382 = vmatprep.subr.bf16.mxu1 %v3862_v44 }
 0x499   :  { %1379 = vmatpush1.bf16.msra.mxu0 %v3397_v6  ;;  %2383 = vmatpush3.bf16.msra.mxu1 %v3493_v9 }
 0x49a   :  { %1380 = vmatprep.subr.bf16.mxu0 %v3401_v12  ;;  %2384 = vmatprep.subr.bf16.mxu1 %v3862_v44 }
 0x49d   :  { %1381 = vmatpush1.bf16.msra.mxu0 %v3405_v7  ;;  %2385 = vmatpush3.bf16.msra.mxu1 %v3499_v59 }
 0x49e   :  { %1382 = vmatprep.subr.bf16.mxu0 %v3502_v54  ;;  %2386 = vmatprep.subr.bf16.mxu1 %v3862_v44 }
 0x4a1   :  { %1383 = vmatpush1.bf16.msra.mxu0 %v3506_v58  ;;  %2387 = vmatpush3.bf16.msra.mxu1 %v3509_v1 }
 0x4a2   :  { %1384 = vmatprep.subr.bf16.mxu0 %v3512_v63  ;;  %2388 = vmatprep.subr.bf16.mxu1 %v3862_v44 }
 0x4a5   :  { %1385 = vmatpush1.bf16.msra.mxu0 %v3516_v52  ;;  %2389 = vmatpush3.bf16.msra.mxu1 %v3519_v46 }
 0x4a6   :  { %1386 = vmatprep.subr.bf16.mxu0 %v3522_v2  ;;  %2390 = vmatprep.subr.bf16.mxu1 %v3862_v44 }
 0x4a9   :  { %1387 = vmatpush1.bf16.msra.mxu0 %v3526_v62  ;;  %2391 = vmatpush3.bf16.msra.mxu1 %v3529_v56 }
 0x4aa   :  { %1454 = vmatprep.subr.bf16.mxu0 %v3532_v14  ;;  %2396 = vmatprep.subr.bf16.mxu1 %v3862_v44 }
 0x4ac   :  { %1405 = vmatmul.mubr.bf16.vlgmr.msra.gmra.mrb[20].mxu0 %v1370_v22  ;;  %2393 = vmatmul.mubr.bf16.vlgmr.msra.gmra.mrb[40].mxu1 %v1370_v22 }
 0x4ad   :  { %1455 = vmatpush1.bf16.msra.mxu0 %v3538_v23  ;;  %2397 = vmatpush3.bf16.msra.mxu1 %v3541_v24 }
 0x4ae   :  { %1456 = vmatprep.subr.bf16.mxu0 %v3544_v26  ;;  %2398 = vmatprep.subr.bf16.mxu1 %v3862_v44 }
 0x4af   :  { %1486 = vmatprep.mubr.bf16.mxu0 %v3863_v55  ;;  %2412 = vmatprep.mubr.msk.bf16.mxu1 %vm2854_vm0, %v3862_v44 }
 0x4b1   :  { %1457 = vmatpush1.bf16.msra.mxu0 %v3551_v27  ;;  %2399 = vmatpush3.bf16.msra.mxu1 %v3554_v28 }
 0x4b2   :  { %1458 = vmatprep.subr.bf16.mxu0 %v3557_v29  ;;  %2400 = vmatprep.subr.bf16.mxu1 %v3862_v44 }
 0x4b5   :  { %1459 = vmatpush1.bf16.msra.mxu0 %v3561_v30  ;;  %2401 = vmatpush3.bf16.msra.mxu1 %v3564_v31 }
 0x4b6   :  { %1460 = vmatprep.subr.bf16.mxu0 %v3567_v32  ;;  %2402 = vmatprep.subr.bf16.mxu1 %v3862_v44 }
 0x4b9   :  { %1461 = vmatpush1.bf16.msra.mxu0 %v3571_v33  ;;  %2403 = vmatpush3.bf16.msra.mxu1 %v3574_v34 }
 0x4ba   :  { %1462 = vmatprep.subr.bf16.mxu0 %v3577_v35  ;;  %2404 = vmatprep.subr.bf16.mxu1 %v3862_v44 }
 0x4bd   :  { %1463 = vmatpush1.bf16.msra.mxu0 %v3581_v36  ;;  %2405 = vmatpush3.bf16.msra.mxu1 %v3584_v37 }
 0x4be   :  { %1464 = vmatprep.subr.bf16.mxu0 %v3587_v38  ;;  %2406 = vmatprep.subr.bf16.mxu1 %v3862_v44 }
 0x4c1   :  { %1465 = vmatpush1.bf16.msra.mxu0 %v3591_v39  ;;  %2407 = vmatpush3.bf16.msra.mxu1 %v3594_v40 }
 0x4c2   :  { %1466 = vmatprep.subr.bf16.mxu0 %v3597_v42  ;;  %2408 = vmatprep.subr.bf16.mxu1 %v3862_v44 }
 0x4c5   :  { %1467 = vmatpush1.bf16.msra.mxu0 %v3601_v45  ;;  %2409 = vmatpush3.bf16.msra.mxu1 %v3604_v10 }
 0x4c6   :  { %1468 = vmatprep.subr.bf16.mxu0 %v3607_v11  ;;  %2410 = vmatprep.subr.bf16.mxu1 %v3862_v44 }
 0x4c9   :  { %1469 = vmatpush1.bf16.msra.mxu0 %v3611_v13  ;;  %2411 = vmatpush3.bf16.msra.mxu1 %v3614_v41 }
 0x4ca   :  { %1564 = vmatprep.subr.bf16.mxu0 %v3458_v20  ;;  %2416 = vmatprep.subr.bf16.mxu1 %v3862_v44 }
 0x55f   :  { %v1293_v49 = vpop.f32.mrb[16].mxu0  ;;  %v1334_v48 = vpop.f32.mrb[36].mxu1 }
 0x560   :  { %v2504_v16 = vadd.f32 %v1293_v49, %v3181_v25  ;;  %v1295_v17 = vpop.f32.mrb[17].mxu0  ;;  %v2374_v18 = vpop.f32.mrb[37].mxu1  ;;  %v1354_v39 = vadd.f32 %v1334_v48, %v3190_v0  ;;  %v3888_v48 = vld [vmem:[#allocation18_spill] sm:$0xff] }
 0x561   :  { %v1297_v19 = vpop.f32.mrb[18].mxu0  ;;  %v1337_v21 = vpop.f32.mrb[38].mxu1  ;;  %v2505_v13 = vadd.f32 %v1295_v17, %v3183_v53  ;;  %v1253_v18 = vadd.f32 %v3536_v15, %v3192_v50 }
 0x562   :  { %v2021_v22 = vmul.f32 -1.442695, %v2504_v16  ;;  %v1298_v11 = vpop.f32.mrb[19].mxu0  ;;  %v2375_v10 = vpop.f32.mrb[39].mxu1  ;;  %v3889_v21 = vld [vmem:[#allocation14_spill] sm:$0xff] }
 0x563   :  { %v2022_v45 = vmul.f32 -1.442695, %v2505_v13 }
 0x564   :  { %2664 = vpow2.f32 %v2021_v22  ;;  %v3890_v22 = vld [vmem:[#allocation15_spill] sm:$0xff] }
 0x565   :  { %2666 = vpow2.f32 %v2022_v45 }
 0x56e   :  { %v2665_v41 = vpop.eup %2664 }
 0x56f   :  { %v1344_v20 = vadd.f32 1.0, %v2665_v41  ;;  %v2667_v42 = vpop.eup %2666 }
 0x570   :  { %v1351_v40 = vadd.f32 1.0, %v2667_v42 }
 0x571   :  { %2668 = vrcp.f32 %v1344_v20 }
 0x572   :  { %2670 = vrcp.f32 %v1351_v40  ;;  %v2622_v40 = vld [vmem:[#allocation2] ss:$0 sps:$4 sm:$0x88]  }
 0x573   :  { %v1562_v42 = vrot.slane %v2622_v40, 3 }
 0x57b   :  { %v2669_v49 = vpop.eup %2668 }
 0x57c   :  { %v1355_v19 = vmul.f32 %v2669_v49, %v1354_v39  ;;  %v2671_v10 = vpop.eup %2670  ;;  %v3891_v49 = vld [vmem:[#allocation19_spill] sm:$0xff] }
 0x57d   :  { %v1358_v16 = vsub.f32 1.0, %v2671_v10  ;;  %v1360_v45 = vmul.f32 %v2671_v10, %v3468_v61  ;;  %v3895_v10 = vld [vmem:[#allocation12_spill] sm:$0xff] }
 0x57e   :  { %v1356_v11 = vadd.f32 %v1355_v19, %v1253_v18  ;;  %v3892_v18 = vld [vmem:[#allocation16_spill] sm:$0xff]  ;;  %v3893_v19 = vld [vmem:[#allocation17_spill] sm:$0xff] }
 0x57f   :  { %v3665_v20 = vpop.f32.mrb[40].mxu1 }
 0x580   :  { %2672 = vtanh.f32 %v1356_v11  ;;  %v2394_v61 = vpop.f32.mrb[41].mxu1  ;;  %v3894_v11 = vld [vmem:[#allocation20_spill] sm:$0xff] }
 0x581   :  { %v1450_v15 = vpop.f32.mrb[42].mxu1 }
 0x582   :  { %v2395_v39 = vpop.f32.mrb[43].mxu1 }
 0x58a   :  { %v2673_v17 = vpop.eup %2672 }
 0x58b   :  { %v1359_v13 = vmul.f32 %v2673_v17, %v1358_v16  ;;  %v3896_v16 = vld [vmem:[#allocation13_spill] sm:$0xff] }
 0x58d   :  { %v3625_v41 = vadd.f32 %v1360_v45, %v1359_v13 }
 0x58f   :  { %1362 = vst [vmem:[#allocation8 + $0x4] sm:$0x1] %v3625_v41  ;;  %v1453_v0 = vpack.c.bf16 %v3625_v41, %v3625_v41 }
 0x591   :  { %1487 = vmatmul.mubr.bf16.vlgmr.msra.gmra.mrb[20].mxu0 %v1453_v0  ;;  %2413 = vmatmul.mubr.bf16.vlgmr.msra.gmra.mrb[44].mxu1 %v1453_v0 }
 0x592   :  { %1565 = vmatpush1.bf16.msra.mxu0 %v3368_v3  ;;  %2417 = vmatpush3.bf16.msra.mxu1 %v3371_v47 }
 0x593   :  { %1566 = vmatprep.subr.bf16.mxu0 %v3374_v51  ;;  %2418 = vmatprep.subr.bf16.mxu1 %v3862_v44 }
 0x594   :  { %1596 = vmatprep.mubr.bf16.mxu0 %v3863_v55  ;;  %2432 = vmatprep.mubr.msk.bf16.mxu1 %vm2854_vm0, %v3862_v44 }
 0x596   :  { %1567 = vmatpush1.bf16.msra.mxu0 %v3381_v60  ;;  %2419 = vmatpush3.bf16.msra.mxu1 %v3481_v57 }
 0x597   :  { %1568 = vmatprep.subr.bf16.mxu0 %v3385_v43  ;;  %2420 = vmatprep.subr.bf16.mxu1 %v3862_v44 }
 0x59a   :  { %1569 = vmatpush1.bf16.msra.mxu0 %v3389_v4  ;;  %2421 = vmatpush3.bf16.msra.mxu1 %v3487_v8 }
 0x59b   :  { %1570 = vmatprep.subr.bf16.mxu0 %v3393_v5  ;;  %2422 = vmatprep.subr.bf16.mxu1 %v3862_v44 }
 0x59e   :  { %1571 = vmatpush1.bf16.msra.mxu0 %v3397_v6  ;;  %2423 = vmatpush3.bf16.msra.mxu1 %v3493_v9 }
 0x59f   :  { %1572 = vmatprep.subr.bf16.mxu0 %v3401_v12  ;;  %2424 = vmatprep.subr.bf16.mxu1 %v3862_v44 }
 0x5a2   :  { %1573 = vmatpush1.bf16.msra.mxu0 %v3405_v7  ;;  %2425 = vmatpush3.bf16.msra.mxu1 %v3499_v59 }
 0x5a3   :  { %1574 = vmatprep.subr.bf16.mxu0 %v3502_v54  ;;  %2426 = vmatprep.subr.bf16.mxu1 %v3862_v44 }
 0x5a6   :  { %1575 = vmatpush1.bf16.msra.mxu0 %v3506_v58  ;;  %2427 = vmatpush3.bf16.msra.mxu1 %v3509_v1 }
 0x5a7   :  { %1576 = vmatprep.subr.bf16.mxu0 %v3512_v63  ;;  %2428 = vmatprep.subr.bf16.mxu1 %v3862_v44 }
 0x5aa   :  { %1577 = vmatpush1.bf16.msra.mxu0 %v3516_v52  ;;  %2429 = vmatpush3.bf16.msra.mxu1 %v3519_v46 }
 0x5ab   :  { %1578 = vmatprep.subr.bf16.mxu0 %v3522_v2  ;;  %2430 = vmatprep.subr.bf16.mxu1 %v3862_v44 }
 0x5ae   :  { %1579 = vmatpush1.bf16.msra.mxu0 %v3526_v62  ;;  %2431 = vmatpush3.bf16.msra.mxu1 %v3529_v56 }
 0x5af   :  { %1646 = vmatprep.subr.bf16.mxu0 %v3532_v14  ;;  %2436 = vmatprep.subr.bf16.mxu1 %v3862_v44 }
 0x5b1   :  { %1597 = vmatmul.mubr.bf16.vlgmr.msra.gmra.mrb[24].mxu0 %v1562_v42  ;;  %2433 = vmatmul.mubr.bf16.vlgmr.msra.gmra.mrb[48].mxu1 %v1562_v42 }
 0x5b2   :  { %1647 = vmatpush1.bf16.msra.mxu0 %v3538_v23  ;;  %2437 = vmatpush3.bf16.msra.mxu1 %v3541_v24 }
 0x5b3   :  { %1648 = vmatprep.subr.bf16.mxu0 %v3544_v26  ;;  %2438 = vmatprep.subr.bf16.mxu1 %v3862_v44 }
 0x5b4   :  { %1678 = vmatprep.mubr.bf16.mxu0 %v3863_v55  ;;  %2452 = vmatprep.mubr.msk.bf16.mxu1 %vm2854_vm0, %v3862_v44 }
 0x5b6   :  { %1649 = vmatpush1.bf16.msra.mxu0 %v3551_v27  ;;  %2439 = vmatpush3.bf16.msra.mxu1 %v3554_v28 }
 0x5b7   :  { %1650 = vmatprep.subr.bf16.mxu0 %v3557_v29  ;;  %2440 = vmatprep.subr.bf16.mxu1 %v3862_v44 }
 0x5ba   :  { %1651 = vmatpush1.bf16.msra.mxu0 %v3561_v30  ;;  %2441 = vmatpush3.bf16.msra.mxu1 %v3564_v31 }
 0x5bb   :  { %1652 = vmatprep.subr.bf16.mxu0 %v3567_v32  ;;  %2442 = vmatprep.subr.bf16.mxu1 %v3862_v44 }
 0x5be   :  { %1653 = vmatpush1.bf16.msra.mxu0 %v3571_v33  ;;  %2443 = vmatpush3.bf16.msra.mxu1 %v3574_v34 }
 0x5bf   :  { %1654 = vmatprep.subr.bf16.mxu0 %v3577_v35  ;;  %2444 = vmatprep.subr.bf16.mxu1 %v3862_v44 }
 0x5c2   :  { %1655 = vmatpush1.bf16.msra.mxu0 %v3581_v36  ;;  %2445 = vmatpush3.bf16.msra.mxu1 %v3584_v37 }
 0x5c3   :  { %1656 = vmatprep.subr.bf16.mxu0 %v3587_v38  ;;  %2446 = vmatprep.subr.bf16.mxu1 %v3862_v44 }
 0x5c6   :  { %1657 = vmatpush1.bf16.msra.mxu0 %v3888_v48  ;;  %2447 = vmatpush3.bf16.msra.mxu1 %v3889_v21 }
 0x5c7   :  { %1658 = vmatprep.subr.bf16.mxu0 %v3890_v22  ;;  %2448 = vmatprep.subr.bf16.mxu1 %v3862_v44 }
 0x5ca   :  { %1659 = vmatpush1.bf16.msra.mxu0 %v3891_v49  ;;  %2449 = vmatpush3.bf16.msra.mxu1 %v3892_v18 }
 0x5cb   :  { %1660 = vmatprep.subr.bf16.mxu0 %v3893_v19  ;;  %2450 = vmatprep.subr.bf16.mxu1 %v3862_v44 }
 0x5ce   :  { %1661 = vmatpush1.bf16.msra.mxu0 %v3894_v11  ;;  %2451 = vmatpush3.bf16.msra.mxu1 %v3895_v10 }
 0x5cf   :  { %1759 = vmatprep.subr.bf16.mxu0 %v3896_v16  ;;  %2456 = vmatprep.subr.bf16.mxu1 %v3862_v44 }
 0x664   :  { %v1488_v17 = vpop.f32.mrb[20].mxu0  ;;  %v1529_v13 = vpop.f32.mrb[44].mxu1 }
 0x665   :  { %v2506_v45 = vadd.f32 %v1488_v17, %v3181_v25  ;;  %v1490_v0 = vpop.f32.mrb[21].mxu0  ;;  %v2414_v61 = vpop.f32.mrb[45].mxu1  ;;  %v3707_v17 = vld [vmem:[%s3812_s5] sm:$0x1]  ;;  %s2855_s5 = smov [#allocation8]  }
 0x666   :  { %v1492_v15 = vpop.f32.mrb[22].mxu0  ;;  %v1532_v39 = vpop.f32.mrb[46].mxu1  ;;  %v2507_v18 = vadd.f32 %v1490_v0, %v3183_v53  ;;  %v1549_v61 = vadd.f32 %v3707_v17, %v1529_v13  ;;  %s1951_s14 = sshll.u32 %s2855_s5, 4  ;;  %s1952_s14 = int_to_ptr.vmem [resolvable:$true] %s1951_s14 }
 0x667   :  { %v2024_v40 = vmul.f32 -1.442695, %v2506_v45  ;;  %v1493_v42 = vpop.f32.mrb[23].mxu0  ;;  %v2415_v19 = vpop.f32.mrb[47].mxu1  ;;  %s2819_s15 = scalar_lea.vmem %s1952_s14, 128  ;;  %p2824_p11 = scmp.lt.s32.totalorder %s1952_s14, %s1952_s14 }
 0x668   :  { %v2025_v11 = vmul.f32 -1.442695, %v2507_v18  ;;  %v1448_v19 = vadd.f32 %v3665_v20, %v3192_v50  ;;  %p2820_p10 = scmp.ne.s32.totalorder %s1952_s14, %s2819_s15  ;;  %p2825_p12 = scmp.lt.s32.totalorder %s2819_s15, %s2819_s15 }
 0x669   :  { %2674 = vpow2.f32 %v2024_v40 }
 0x66a   :  { %2676 = vpow2.f32 %v2025_v11  ;;  %p2826_p13 = por %p2825_p12, %p2824_p11 }
 0x66c   :  { %p2827_p0 = pnand %p2826_p13, %p2820_p10 }
 0x673   :  { %v2675_v10 = vpop.eup %2674 }
 0x674   :  { %v1539_v16 = vadd.f32 1.0, %v2675_v10  ;;  %v2677_v49 = vpop.eup %2676 }
 0x675   :  { %v1546_v22 = vadd.f32 1.0, %v2677_v49 }
 0x676   :  { %2678 = vrcp.f32 %v1539_v16 }
 0x677   :  { %2680 = vrcp.f32 %v1546_v22 }
 0x680   :  { %v2679_v45 = vpop.eup %2678 }
 0x681   :  { %v1550_v0 = vmul.f32 %v2679_v45, %v1549_v61  ;;  %v2681_v11 = vpop.eup %2680 }
 0x682   :  { %v1553_v10 = vsub.f32 1.0, %v2681_v11  ;;  %v1555_v49 = vmul.f32 %v2681_v11, %v3625_v41 }
 0x683   :  { %v1551_v18 = vadd.f32 %v1550_v0, %v1448_v19 }
 0x685   :  { %2682 = vtanh.f32 %v1551_v18 }
 0x68f   :  { %v2683_v15 = vpop.eup %2682 }
 0x690   :  { %v1554_v39 = vmul.f32 %v2683_v15, %v1553_v10 }
 0x692   :  { %v3713_v40 = vadd.f32 %v1555_v49, %v1554_v39 }
 0x694   :  { %1557 = vst [vmem:[#allocation8 + $0x5] sm:$0x1] %v3713_v40  ;;  %v1645_v13 = vpack.c.bf16 %v3713_v40, %v3713_v40 }
 0x696   :  { %1679 = vmatmul.mubr.bf16.vlgmr.msra.gmra.mrb[24].mxu0 %v1645_v13  ;;  %2453 = vmatmul.mubr.bf16.vlgmr.msra.gmra.mrb[52].mxu1 %v1645_v13 }
 0x697   :  { %1760 = vmatpush1.bf16.msra.mxu0 %v3368_v3  ;;  %2457 = vmatpush3.bf16.msra.mxu1 %v3371_v47  ;;  %v1639_v3 = vpop.f32.mrb[48].mxu1 }
 0x698   :  { %1761 = vmatprep.subr.bf16.mxu0 %v3374_v51  ;;  %2458 = vmatprep.subr.bf16.mxu1 %v3862_v44  ;;  %v2434_v47 = vpop.f32.mrb[49].mxu1 }
 0x699   :  { %1791 = vmatprep.mubr.bf16.mxu0 %v3863_v55  ;;  %2472 = vmatprep.mubr.msk.bf16.mxu1 %vm2854_vm0, %v3862_v44  ;;  %v1642_v51 = vpop.f32.mrb[50].mxu1 }
 0x69b   :  { %1762 = vmatpush1.bf16.msra.mxu0 %v3381_v60  ;;  %2459 = vmatpush3.bf16.msra.mxu1 %v3481_v57  ;;  %v2435_v60 = vpop.f32.mrb[51].mxu1  ;;  %v3901_v57 = vld [vmem:[#allocation20_spill] sm:$0xff] }
 0x69c   :  { %1763 = vmatprep.subr.bf16.mxu0 %v3385_v43  ;;  %2460 = vmatprep.subr.bf16.mxu1 %v3862_v44  ;;  %v2623_v43 = vld [vmem:[#allocation2] ss:$0 sps:$4 sm:$0x88]  }
 0x69f   :  { %1764 = vmatpush1.bf16.msra.mxu0 %v3389_v4  ;;  %2461 = vmatpush3.bf16.msra.mxu1 %v3487_v8  ;;  %v1755_v4 = vshrl.u32 %v2623_v43, 16  ;;  %v3902_v8 = vld [vmem:[#allocation12_spill] sm:$0xff] }
 0x6a0   :  { %1765 = vmatprep.subr.bf16.mxu0 %v3393_v5  ;;  %2462 = vmatprep.subr.bf16.mxu1 %v3862_v44 }
 0x6a1   :  { %v1757_v5 = vrot.slane %v1755_v4, 3 }
 0x6a3   :  { %1766 = vmatpush1.bf16.msra.mxu0 %v3397_v6  ;;  %2463 = vmatpush3.bf16.msra.mxu1 %v3493_v9  ;;  %v3898_v6 = vld [vmem:[#allocation19_spill] sm:$0xff] }
 0x6a4   :  { %1767 = vmatprep.subr.bf16.mxu0 %v3401_v12  ;;  %2464 = vmatprep.subr.bf16.mxu1 %v3862_v44  ;;  %v3899_v12 = vld [vmem:[#allocation16_spill] sm:$0xff] }
 0x6a7   :  { %1768 = vmatpush1.bf16.msra.mxu0 %v3405_v7  ;;  %2465 = vmatpush3.bf16.msra.mxu1 %v3499_v59  ;;  %v3900_v7 = vld [vmem:[#allocation17_spill] sm:$0xff] }
 0x6a8   :  { %1769 = vmatprep.subr.bf16.mxu0 %v3502_v54  ;;  %2466 = vmatprep.subr.bf16.mxu1 %v3862_v44 }
 0x6ab   :  { %1770 = vmatpush1.bf16.msra.mxu0 %v3506_v58  ;;  %2467 = vmatpush3.bf16.msra.mxu1 %v3509_v1 }
 0x6ac   :  { %1771 = vmatprep.subr.bf16.mxu0 %v3512_v63  ;;  %2468 = vmatprep.subr.bf16.mxu1 %v3862_v44 }
 0x6af   :  { %1772 = vmatpush1.bf16.msra.mxu0 %v3516_v52  ;;  %2469 = vmatpush3.bf16.msra.mxu1 %v3519_v46 }
 0x6b0   :  { %1773 = vmatprep.subr.bf16.mxu0 %v3522_v2  ;;  %2470 = vmatprep.subr.bf16.mxu1 %v3862_v44 }
 0x6b3   :  { %1774 = vmatpush1.bf16.msra.mxu0 %v3526_v62  ;;  %2471 = vmatpush3.bf16.msra.mxu1 %v3529_v56 }
 0x6b4   :  { %1841 = vmatprep.subr.bf16.mxu0 %v3532_v14  ;;  %2476 = vmatprep.subr.bf16.mxu1 %v3862_v44 }
 0x6b6   :  { %1792 = vmatmul.mubr.bf16.vlgmr.msra.gmra.mrb[28].mxu0 %v1757_v5  ;;  %2473 = vmatmul.mubr.bf16.vlgmr.msra.gmra.mrb[56].mxu1 %v1757_v5 }
 0x6b7   :  { %1842 = vmatpush1.bf16.msra.mxu0 %v3538_v23  ;;  %2477 = vmatpush3.bf16.msra.mxu1 %v3541_v24 }
 0x6b8   :  { %1843 = vmatprep.subr.bf16.mxu0 %v3544_v26  ;;  %2478 = vmatprep.subr.bf16.mxu1 %v3862_v44 }
 0x6b9   :  { %1873 = vmatprep.mubr.bf16.mxu0 %v3863_v55  ;;  %2492 = vmatprep.mubr.msk.bf16.mxu1 %vm2854_vm0, %v3862_v44  ;;  %v3897_v55 = vld [vmem:[#allocation15_spill] sm:$0xff] }
 0x6bb   :  { %1844 = vmatpush1.bf16.msra.mxu0 %v3551_v27  ;;  %2479 = vmatpush3.bf16.msra.mxu1 %v3554_v28 }
 0x6bc   :  { %1845 = vmatprep.subr.bf16.mxu0 %v3557_v29  ;;  %2480 = vmatprep.subr.bf16.mxu1 %v3862_v44  ;;  %v1640_v29 = vadd.f32 %v1639_v3, %v3192_v50 }
 0x6bf   :  { %1846 = vmatpush1.bf16.msra.mxu0 %v3561_v30  ;;  %2481 = vmatpush3.bf16.msra.mxu1 %v3564_v31 }
 0x6c0   :  { %1847 = vmatprep.subr.bf16.mxu0 %v3567_v32  ;;  %2482 = vmatprep.subr.bf16.mxu1 %v3862_v44 }
 0x6c3   :  { %1848 = vmatpush1.bf16.msra.mxu0 %v3571_v33  ;;  %2483 = vmatpush3.bf16.msra.mxu1 %v3574_v34 }
 0x6c4   :  { %1849 = vmatprep.subr.bf16.mxu0 %v3577_v35  ;;  %2484 = vmatprep.subr.bf16.mxu1 %v3862_v44 }
 0x6c7   :  { %1850 = vmatpush1.bf16.msra.mxu0 %v3581_v36  ;;  %2485 = vmatpush3.bf16.msra.mxu1 %v3584_v37 }
 0x6c8   :  { %1851 = vmatprep.subr.bf16.mxu0 %v3587_v38  ;;  %2486 = vmatprep.subr.bf16.mxu1 %v3862_v44 }
 0x6cb   :  { %1852 = vmatpush1.bf16.msra.mxu0 %v3888_v48  ;;  %2487 = vmatpush3.bf16.msra.mxu1 %v3889_v21 }
 0x6cc   :  { %1853 = vmatprep.subr.bf16.mxu0 %v3897_v55  ;;  %2488 = vmatprep.subr.bf16.mxu1 %v3862_v44 }
 0x6cf   :  { %1854 = vmatpush1.bf16.msra.mxu0 %v3898_v6  ;;  %2489 = vmatpush3.bf16.msra.mxu1 %v3899_v12 }
 0x6d0   :  { %1855 = vmatprep.subr.bf16.mxu0 %v3900_v7  ;;  %2490 = vmatprep.subr.bf16.mxu1 %v3862_v44 }
 0x6d3   :  { %1856 = vmatpush1.bf16.msra.mxu0 %v3901_v57  ;;  %2491 = vmatpush3.bf16.msra.mxu1 %v3902_v8 }
 0x769   :  { %v1680_v9 = vpop.f32.mrb[24].mxu0  ;;  %v1721_v59 = vpop.f32.mrb[52].mxu1 }
 0x76a   :  { %v2508_v54 = vadd.f32 %v1680_v9, %v3181_v25  ;;  %v1682_v58 = vpop.f32.mrb[25].mxu0  ;;  %v2454_v1 = vpop.f32.mrb[53].mxu1  ;;  %v1741_v27 = vadd.f32 %v3707_v17, %v1721_v59 }
 0x76b   :  { %v1684_v63 = vpop.f32.mrb[26].mxu0  ;;  %v1724_v52 = vpop.f32.mrb[54].mxu1  ;;  %v2509_v56 = vadd.f32 %v1682_v58, %v3183_v53 }
 0x76c   :  { %v2027_v46 = vmul.f32 -1.442695, %v2508_v54  ;;  %v1685_v2 = vpop.f32.mrb[27].mxu0  ;;  %v2455_v62 = vpop.f32.mrb[55].mxu1 }
 0x76d   :  { %v2028_v14 = vmul.f32 -1.442695, %v2509_v56 }
 0x76e   :  { %2684 = vpow2.f32 %v2027_v46 }
 0x76f   :  { %2686 = vpow2.f32 %v2028_v14 }
 0x778   :  { %v2685_v44 = vpop.eup %2684 }
 0x779   :  { %v1731_v23 = vadd.f32 1.0, %v2685_v44  ;;  %v2687_v24 = vpop.eup %2686 }
 0x77a   :  { %v1738_v26 = vadd.f32 1.0, %v2687_v24 }
 0x77b   :  { %2688 = vrcp.f32 %v1731_v23 }
 0x77c   :  { %2690 = vrcp.f32 %v1738_v26 }
 0x785   :  { %v2689_v28 = vpop.eup %2688 }
 0x786   :  { %v1742_v30 = vmul.f32 %v2689_v28, %v1741_v27  ;;  %v2691_v32 = vpop.eup %2690 }
 0x787   :  { %v1745_v33 = vsub.f32 1.0, %v2691_v32  ;;  %v1747_v36 = vmul.f32 %v2691_v32, %v3713_v40 }
 0x788   :  { %v1743_v31 = vadd.f32 %v1742_v30, %v1640_v29 }
 0x789   :  { %v1834_v41 = vpop.f32.mrb[56].mxu1 }
 0x78a   :  { %2692 = vtanh.f32 %v1743_v31  ;;  %v2474_v20 = vpop.f32.mrb[57].mxu1  ;;  %v1835_v51 = vadd.f32 %v1834_v41, %v3192_v50 }
 0x78b   :  { %v1837_v48 = vpop.f32.mrb[58].mxu1 }
 0x78c   :  { %v2475_v21 = vpop.f32.mrb[59].mxu1 }
 0x794   :  { %v2693_v34 = vpop.eup %2692 }
 0x795   :  { %v1746_v35 = vmul.f32 %v2693_v34, %v1745_v33 }
 0x797   :  { %v1748_v37 = vadd.f32 %v1747_v36, %v1746_v35 }
 0x799   :  { %1749 = vst [vmem:[#allocation8 + $0x6] sm:$0x1] %v1748_v37  ;;  %v1840_v38 = vpack.c.bf16 %v1748_v37, %v1748_v37 }
 0x79b   :  { %1874 = vmatmul.mubr.bf16.vlgmr.msra.gmra.mrb[28].mxu0 %v1840_v38  ;;  %2493 = vmatmul.mubr.bf16.vlgmr.msra.gmra.mrb[60].mxu1 %v1840_v38 }
 0x86e   :  { %v1875_v22 = vpop.f32.mrb[28].mxu0  ;;  %v1916_v42 = vpop.f32.mrb[60].mxu1 }
 0x86f   :  { %v2510_v16 = vadd.f32 %v1875_v22, %v3181_v25  ;;  %v1877_v61 = vpop.f32.mrb[29].mxu0  ;;  %v2494_v45 = vpop.f32.mrb[61].mxu1  ;;  %v1936_v47 = vadd.f32 %v3707_v17, %v1916_v42 }
 0x870   :  { %v1879_v19 = vpop.f32.mrb[30].mxu0  ;;  %v1919_v0 = vpop.f32.mrb[62].mxu1  ;;  %v2511_v15 = vadd.f32 %v1877_v61, %v3183_v53 }
 0x871   :  { %v2030_v18 = vmul.f32 -1.442695, %v2510_v16  ;;  %v1880_v11 = vpop.f32.mrb[31].mxu0  ;;  %v2495_v10 = vpop.f32.mrb[63].mxu1 }
 0x872   :  { %v2031_v39 = vmul.f32 -1.442695, %v2511_v15 }
 0x873   :  { %2694 = vpow2.f32 %v2030_v18 }
 0x874   :  { %2696 = vpow2.f32 %v2031_v39 }
 0x87d   :  { %v2695_v49 = vpop.eup %2694 }
 0x87e   :  { %v1926_v40 = vadd.f32 1.0, %v2695_v49  ;;  %v2697_v13 = vpop.eup %2696 }
 0x87f   :  { %v1933_v3 = vadd.f32 1.0, %v2697_v13 }
 0x880   :  { %2698 = vrcp.f32 %v1926_v40 }
 0x881   :  { %2700 = vrcp.f32 %v1933_v3 }
 0x88a   :  { %v2699_v25 = vpop.eup %2698 }
 0x88b   :  { %v1937_v60 = vmul.f32 %v2699_v25, %v1936_v47  ;;  %v2701_v4 = vpop.eup %2700 }
 0x88c   :  { %v1940_v5 = vsub.f32 1.0, %v2701_v4  ;;  %v1942_v6 = vmul.f32 %v2701_v4, %v1748_v37 }
 0x88d   :  { %v1938_v43 = vadd.f32 %v1937_v60, %v1835_v51 }
 0x88f   :  { %2702 = vtanh.f32 %v1938_v43 }
 0x899   :  { %v2703_v53 = vpop.eup %2702 }
 0x89a   :  { %v1941_v55 = vmul.f32 %v2703_v53, %v1940_v5 }
 0x89c   :  { %v1943_v12 = vadd.f32 %v1942_v6, %v1941_v55 }
 0x89e   :  { %1944 = vst [vmem:[#allocation8 + $0x7] sm:$0x1] %v1943_v12 }
 0x89f   :  { %2830 = shalt.err (!%p2827_p0)
}
 0x8a0   :  { %s2831_s18 = scalar_lea.hbm %s3813_s6, 128 }
 0x8a1   :  { %p2832_p1 = scmp.ne.s32.totalorder %s3813_s6, %s2831_s18  ;;  %p2835_p2 = scmp.lt.u32.totalorder %s2831_s18, %s3813_s6 }
 0x8a3   :  { %p2837_p3 = pnand %p2835_p2, %p2832_p1 }
 0x8a5   :  { %2840 = shalt.err (!%p2837_p3)
}
 0x8a6   :  { %1954 = dma.vmem_to_hbm [thread:$0]  %s1952_s14, 128, %s3813_s6, [#allocation4]  }
 0x8a7   :  { %2845 = dma.done.wait [#allocation4], 128  }
 0x8a8   :  { %2846 = vsyncadd [#allocation4], 4294967168 }
 0x8a9   :  { %1958 = vsyncpa [#allocation3], 1 }
 0x8aa   :  { %1959 = vsyncpa [#allocation6], 1 }
 0x8ab   :  { %1960 = vsyncpa [#allocation4], 1 }

</bundles_post_ra>
